<compile_context>
chip_gen: v6e
topology: v6e:2x2x1
jax: 0.10.0
libtpu: 0.0.40
codegen_flags: <defaults>
</compile_context>

<pallas_src>
import functools

import jax
import jax.numpy as jnp
import numpy as np
from jax.experimental import pallas as pl
from jax.experimental.pallas import tpu as pltpu

CLASSIFICATION_HIDDEN_SIZE = 500
NUM_CLASSES = 2
DROPOUT_RATE = 0.3  # eval-mode dropout is identity (see TODO in kernel)

_LANE = 128          # TPU lane width
_MXU_ROWS = 256      # full-height LHS pushes on the 256-row MXU (v6e/v7x);
                     # also a multiple of the 128-row v5e MXU
_MAX_BLOCK_B = 512   # large tiles amortize per-grid-step overhead
_NEG_BIG = -1e30     # bias for padded logit columns -> exp underflows to 0


def _network_kernel(x_ref, w1_ref, b1_ref, w2_ref, b2_ref, o_ref, *, use_bf16_mxu):
    x = x_ref[...]
    if use_bf16_mxu:
        x = x.astype(jnp.bfloat16)          # w1/w2 already bf16 (wrapper cast)

    # fc1 + bias + ReLU (MXU matmul, f32 accumulation; epilogue kept in f32 on
    # all generations -- the v5e VPU has no bf16 path).
    h = jnp.dot(x, w1_ref[...], preferred_element_type=jnp.float32)
    h = jnp.maximum(h + b1_ref[...], 0.0)

    # TODO(synk): nn.Dropout(p=0.3) is identity at inference time; training-mode
    # dropout (pltpu.prng_random_bits mask + 1/(1-p) scale) intentionally omitted.

    # output_layer (lane-dense C_pad-wide result slab)
    if use_bf16_mxu:
        h = h.astype(jnp.bfloat16)
    logits = jnp.dot(h, w2_ref[...], preferred_element_type=jnp.float32) + b2_ref[...]

    # log_softmax over the last dim (numerically stable, f32).  Padded class
    # columns carry a -1e30 bias, so exp() underflows to exactly 0 and they do
    # not perturb the denominator; they are sliced off host-side.
    m = jnp.max(logits, axis=-1, keepdims=True)
    z = logits - m
    lse = jnp.log(jnp.sum(jnp.exp(z), axis=-1, keepdims=True))
    o_ref[...] = (z - lse).astype(o_ref.dtype)


def _round_up(v, m):
    return ((v + m - 1) // m) * m


def network_forward(x, w1, b1, w2, b2, *, block_b=None, use_bf16_mxu=True):
    """x: (B, D) f32; w1: (D, H); b1: (1, H); w2: (H, C); b2: (1, C)."""
    B, D = x.shape
    H = w1.shape[1]
    C = w2.shape[1]

    # --- Host-side padding (all minor dims -> lane-dense) --------------------
    D_pad = _round_up(D, _LANE)
    H_pad = _round_up(H, _LANE)
    C_pad = _round_up(C, _LANE)

    if D_pad != D:
        # Zero-padded x cols / w1 rows contribute nothing to x @ w1.
        x = jnp.pad(x, ((0, 0), (0, D_pad - D)))
        w1 = jnp.pad(w1, ((0, D_pad - D), (0, 0)))
    if H_pad != H:
        # Dead hidden units: w1/b1 pad = 0 => h_pad = relu(0) = 0; w2 pad rows
        # = 0 => zero contribution to logits.
        w1 = jnp.pad(w1, ((0, 0), (0, H_pad - H)))
        b1 = jnp.pad(b1, ((0, 0), (0, H_pad - H)))
        w2 = jnp.pad(w2, ((0, H_pad - H), (0, 0)))
    if C_pad != C:
        # Padded classes must NOT leak into the softmax denominator: zero w2
        # cols + huge negative bias => logits_pad = -1e30 => exp -> 0.
        w2 = jnp.pad(w2, ((0, 0), (0, C_pad - C)))
        b2 = jnp.pad(b2, ((0, 0), (0, C_pad - C)), constant_values=_NEG_BIG)

    # Cast resident weights to bf16 once in the wrapper (halves their VMEM/HBM
    # footprint and removes a per-step in-kernel cast of a constant buffer).
    if use_bf16_mxu:
        w1 = w1.astype(jnp.bfloat16)
        w2 = w2.astype(jnp.bfloat16)

    # Batch tile: 512 rows in production, clamped to a 256-aligned tile for
    # tiny batches so padded compute stays small.  Padded rows are harmless
    # (log_softmax of the bias) and sliced off below.
    if block_b is None:
        block_b = min(_MAX_BLOCK_B, _round_up(max(B, 1), _MXU_ROWS))
    B_pad = _round_up(max(B, 1), block_b)
    if B_pad != B:
        x = jnp.pad(x, ((0, B_pad - B), (0, 0)))

    grid = (B_pad // block_b,)

    kernel = functools.partial(_network_kernel, use_bf16_mxu=use_bf16_mxu)

    w_itemsize = 2 if use_bf16_mxu else 4
    cost = pl.CostEstimate(
        flops=2 * B_pad * D_pad * H_pad + 2 * B_pad * H_pad * C_pad,
        transcendentals=B_pad * (C_pad + 1),
        bytes_accessed=(4 * B_pad * D_pad                                # x
                        + w_itemsize * (D_pad * H_pad + H_pad * C_pad)   # weights
                        + 4 * (H_pad + C_pad)                            # biases
                        + 4 * B_pad * C_pad),                            # out
    )

    out = pl.pallas_call(
        kernel,
        out_shape=jax.ShapeDtypeStruct((B_pad, C_pad), jnp.float32),
        grid_spec=pltpu.PrefetchScalarGridSpec(
            num_scalar_prefetch=0,
            grid=grid,
            in_specs=[
                # x: tiled over batch, double-buffered by the pipeline.
                pl.BlockSpec((block_b, D_pad), lambda i: (i, 0)),
                # Weights / biases: same block every step -> resident in VMEM.
                pl.BlockSpec((D_pad, H_pad), lambda i: (0, 0)),
                pl.BlockSpec((1, H_pad), lambda i: (0, 0)),
                pl.BlockSpec((H_pad, C_pad), lambda i: (0, 0)),
                pl.BlockSpec((1, C_pad), lambda i: (0, 0)),
            ],
            out_specs=pl.BlockSpec((block_b, C_pad), lambda i: (i, 0)),
        ),
        compiler_params=pltpu.CompilerParams(
            # Batch steps are independent -> megacore-shardable on v7x.
            dimension_semantics=("parallel",),
            # Raise v5e's 16 MiB scoped-VMEM default; no-op headroom elsewhere.
            vmem_limit_bytes=32 * 1024 * 1024,
        ),
        cost_estimate=cost,
    )(x, w1, b1, w2, b2)

    return out[:B, :C]


def _reference_np(x, w1, b1, w2, b2):
    """Exact float64 numpy reference (independent of TPU matmul precision)."""
    x, w1, b1, w2, b2 = (np.asarray(a, np.float64) for a in (x, w1, b1, w2, b2))
    h = np.maximum(x @ w1 + b1, 0.0)
    logits = h @ w2 + b2
    m = logits.max(-1, keepdims=True)
    z = logits - m
    return z - np.log(np.exp(z).sum(-1, keepdims=True))


if __name__ == "__main__":
    key = jax.random.PRNGKey(0)
    k_x, k_w1, k_b1, k_w2, k_b2 = jax.random.split(key, 5)

    BATCH = 8
    INPUT_SIZE = 32  # small stand-in for the CodeBERT BOW feature dim
    H = CLASSIFICATION_HIDDEN_SIZE
    C = NUM_CLASSES

    # Deterministic, PyTorch-Linear-style uniform init (bound = 1/sqrt(fan_in)).
    bound1 = 1.0 / (INPUT_SIZE ** 0.5)
    bound2 = 1.0 / (H ** 0.5)
    x = jax.random.normal(k_x, (BATCH, INPUT_SIZE), dtype=jnp.float32)
    w1 = jax.random.uniform(k_w1, (INPUT_SIZE, H), jnp.float32, -bound1, bound1)
    b1 = jax.random.uniform(k_b1, (1, H), jnp.float32, -bound1, bound1)
    w2 = jax.random.uniform(k_w2, (H, C), jnp.float32, -bound2, bound2)
    b2 = jax.random.uniform(k_b2, (1, C), jnp.float32, -bound2, bound2)

    out = network_forward(x, w1, b1, w2, b2)  # default: bf16-MXU, f32 epilogue
    out = jax.block_until_ready(out)

    ref = _reference_np(x, w1, b1, w2, b2)
    assert out.shape == (BATCH, C), out.shape
    assert bool(jnp.all(jnp.isfinite(out))), "non-finite output"
    # bf16 MXU inputs (f32 accumulation) -> loosened tolerance vs f64 reference.
    assert np.allclose(np.asarray(out, np.float64), ref, atol=3e-2, rtol=3e-2), (
        "mismatch vs reference, max abs diff = "
        f"{np.max(np.abs(np.asarray(out, np.float64) - ref))}")

    print("KERNEL_OK")
</pallas_src>

<mosaic_0001>
module attributes {stable_mosaic.version = 11 : i64} {
  func.func @_network_kernel(%arg0: i32, %arg1: memref<256x128xf32, #tpu.memory_space<vmem>>, %arg2: memref<128x512xbf16, #tpu.memory_space<vmem>>, %arg3: memref<1x512xf32, #tpu.memory_space<vmem>>, %arg4: memref<512x128xbf16, #tpu.memory_space<vmem>>, %arg5: memref<1x128xf32, #tpu.memory_space<vmem>>, %arg6: memref<256x128xf32, #tpu.memory_space<vmem>>) attributes {dimension_semantics = [#tpu.dimension_semantics<parallel>], iteration_bounds = array<i64: 1>, scalar_prefetch = 0 : i64, scratch_operands = 0 : i64, tpu.core_type = #tpu.core_type<tc>, window_params = [{transform_indices = @transform_0, window_bounds = array<i64: 256, 128>}, {pipeline_mode = #tpu.pipeline_mode<synchronous>, transform_indices = @transform_1, window_bounds = array<i64: 128, 512>}, {pipeline_mode = #tpu.pipeline_mode<synchronous>, transform_indices = @transform_2, window_bounds = array<i64: 1, 512>}, {pipeline_mode = #tpu.pipeline_mode<synchronous>, transform_indices = @transform_3, window_bounds = array<i64: 512, 128>}, {pipeline_mode = #tpu.pipeline_mode<synchronous>, transform_indices = @transform_4, window_bounds = array<i64: 1, 128>}, {transform_indices = @transform_5, window_bounds = array<i64: 256, 128>}]} {
    %c0 = arith.constant 0 : index
    %c0_0 = arith.constant 0 : index
    %0 = vector.load %arg1[%c0, %c0_0] : memref<256x128xf32, #tpu.memory_space<vmem>>, vector<256x128xf32>
    %1 = arith.truncf %0 : vector<256x128xf32> to vector<256x128xbf16>
    %c0_1 = arith.constant 0 : index
    %c0_2 = arith.constant 0 : index
    %2 = vector.load %arg2[%c0_1, %c0_2] : memref<128x512xbf16, #tpu.memory_space<vmem>>, vector<128x512xbf16>
    %cst = arith.constant dense<0.000000e+00> : vector<256x512xf32>
    %3 = tpu.matmul %1, %2, %cst {dimension_numbers = #tpu.dot_dimension_numbers<[1], [0], [0], [1], [0, 0, 1, 1], [], []>} : vector<256x128xbf16>, vector<128x512xbf16>, vector<256x512xf32> -> vector<256x512xf32>
    %c0_3 = arith.constant 0 : index
    %c0_4 = arith.constant 0 : index
    %4 = vector.load %arg3[%c0_3, %c0_4] : memref<1x512xf32, #tpu.memory_space<vmem>>, vector<1x512xf32>
    %5 = vector.broadcast %4 : vector<1x512xf32> to vector<256x512xf32>
    %6 = arith.addf %3, %5 : vector<256x512xf32>
    %cst_5 = arith.constant 0.000000e+00 : f32
    %7 = vector.broadcast %cst_5 : f32 to vector<256x512xf32>
    %8 = arith.maximumf %6, %7 : vector<256x512xf32>
    %9 = arith.truncf %8 : vector<256x512xf32> to vector<256x512xbf16>
    %c0_6 = arith.constant 0 : index
    %c0_7 = arith.constant 0 : index
    %10 = vector.load %arg4[%c0_6, %c0_7] : memref<512x128xbf16, #tpu.memory_space<vmem>>, vector<512x128xbf16>
    %cst_8 = arith.constant dense<0.000000e+00> : vector<256x128xf32>
    %11 = tpu.matmul %9, %10, %cst_8 {dimension_numbers = #tpu.dot_dimension_numbers<[1], [0], [0], [1], [0, 0, 1, 1], [], []>} : vector<256x512xbf16>, vector<512x128xbf16>, vector<256x128xf32> -> vector<256x128xf32>
    %c0_9 = arith.constant 0 : index
    %c0_10 = arith.constant 0 : index
    %12 = vector.load %arg5[%c0_9, %c0_10] : memref<1x128xf32, #tpu.memory_space<vmem>>, vector<1x128xf32>
    %13 = vector.broadcast %12 : vector<1x128xf32> to vector<256x128xf32>
    %14 = arith.addf %11, %13 : vector<256x128xf32>
    %cst_11 = arith.constant dense<0xFF800000> : vector<256xf32>
    %15 = vector.multi_reduction <maximumf>, %14, %cst_11 [1] : vector<256x128xf32> to vector<256xf32>
    %16 = vector.shape_cast %15 : vector<256xf32> to vector<256x1xf32>
    %17 = vector.broadcast %16 : vector<256x1xf32> to vector<256x128xf32>
    %18 = arith.subf %14, %17 : vector<256x128xf32>
    %19 = math.exp %18 : vector<256x128xf32>
    %cst_12 = arith.constant dense<0.000000e+00> : vector<256xf32>
    %20 = vector.multi_reduction <add>, %19, %cst_12 [1] : vector<256x128xf32> to vector<256xf32>
    %21 = vector.shape_cast %20 : vector<256xf32> to vector<256x1xf32>
    %22 = math.log %21 : vector<256x1xf32>
    %23 = vector.broadcast %22 : vector<256x1xf32> to vector<256x128xf32>
    %24 = arith.subf %18, %23 : vector<256x128xf32>
    %c0_13 = arith.constant 0 : index
    %c0_14 = arith.constant 0 : index
    %25 = vector.load %arg6[%c0_13, %c0_14] : memref<256x128xf32, #tpu.memory_space<vmem>>, vector<256x128xf32>
    tpu.vector_store %arg6[%c0_13, %c0_14], %24 {strides = array<i32>} : memref<256x128xf32, #tpu.memory_space<vmem>>, vector<256x128xf32>,
    return
  }
  func.func @transform_0(%arg0: i32) -> (i32, i32) {
    %c0_i32 = arith.constant 0 : i32
    %c0_i32_0 = arith.constant 0 : i32
    return %arg0, %c0_i32 : i32, i32
  }
  func.func @transform_1(%arg0: i32) -> (i32, i32) {
    %c0_i32 = arith.constant 0 : i32
    %c0_i32_0 = arith.constant 0 : i32
    %c0_i32_1 = arith.constant 0 : i32
    return %c0_i32, %c0_i32_0 : i32, i32
  }
  func.func @transform_2(%arg0: i32) -> (i32, i32) {
    %c0_i32 = arith.constant 0 : i32
    %c0_i32_0 = arith.constant 0 : i32
    %c0_i32_1 = arith.constant 0 : i32
    return %c0_i32, %c0_i32_0 : i32, i32
  }
  func.func @transform_3(%arg0: i32) -> (i32, i32) {
    %c0_i32 = arith.constant 0 : i32
    %c0_i32_0 = arith.constant 0 : i32
    %c0_i32_1 = arith.constant 0 : i32
    return %c0_i32, %c0_i32_0 : i32, i32
  }
  func.func @transform_4(%arg0: i32) -> (i32, i32) {
    %c0_i32 = arith.constant 0 : i32
    %c0_i32_0 = arith.constant 0 : i32
    %c0_i32_1 = arith.constant 0 : i32
    return %c0_i32, %c0_i32_0 : i32, i32
  }
  func.func @transform_5(%arg0: i32) -> (i32, i32) {
    %c0_i32 = arith.constant 0 : i32
    %c0_i32_0 = arith.constant 0 : i32
    return %arg0, %c0_i32 : i32, i32
  }
}

</mosaic_0001>

<bundles_post_ra>
// kernel: tpu_custom_call.1
= control target key start
LH: loop header
LB: loop body
LE: loop exit
PB: predicated region body
PF: predicated region fallthrough
CT: control target
= control target key end

     0   :  { %10 = vsyncpa [#allocation3], 0  ;;  %s3012_s0 = inlined_call_operand.hbm [shape: f32[256,128], index: 0, kind: input, shape index: {}]   ;;  %s3013_s1 = inlined_call_operand.hbm [shape: bf16[128,512], index: 1, kind: input, shape index: {}]   ;;  %s3014_s2 = inlined_call_operand.hbm [shape: f32[1,512], index: 2, kind: input, shape index: {}]   ;;  %s3015_s3 = inlined_call_operand.hbm [shape: bf16[512,128], index: 3, kind: input, shape index: {}]   ;;  %s3016_s4 = inlined_call_operand.vmem [shape: f32[1,128], index: 4, kind: input, shape index: {}]   ;;  %s3017_s5 = inlined_call_operand.hbm [shape: f32[256,128], index: 5, kind: output, shape index: {}]  }
   0x1   :  { %11 = vsyncpa [#allocation6], 0 }
   0x2   :  { %12 = vsyncpa [#allocation9], 0 }
   0x3   :  { %13 = vsyncpa [#allocation4], 0  ;;  %s2488_s18 = smov [#allocation5]  }
   0x4   :  { %s31_s19 = sshll.u32 %s2488_s18, 4  ;;  %s32_s19 = int_to_ptr.vmem [resolvable:$true] %s31_s19 }
   0x5   :  { %s2388_s20 = scalar_lea.vmem %s32_s19, 4096  ;;  %p2393_p1 = scmp.lt.s32.totalorder %s32_s19, %s32_s19 }
   0x6   :  { %p2389_p0 = scmp.ne.s32.totalorder %s32_s19, %s2388_s20  ;;  %p2394_p2 = scmp.lt.s32.totalorder %s2388_s20, %s2388_s20 }
   0x8   :  { %p2395_p3 = por %p2394_p2, %p2393_p1 }
   0xa   :  { %p2396_p4 = pnand %p2395_p3, %p2389_p0 }
   0xc   :  { %2399 = shalt.err (!%p2396_p4)
}
   0xd   :  { %s2489_s21 = smov 256   ;;  %s2490_s22 = smov 16  }
   0xe   :  { %37 = dma.hbm_to_vmem [thread:$0]  %s3013_s1, 4096, %s32_s19, [#allocation6], %s2489_s21, %s2489_s21, %s2490_s22  }
   0xf   :  { %s2491_s25 = smov [#allocation2]  }
  0x10   :  { %s19_s26 = sshll.u32 %s2491_s25, 4  ;;  %s20_s26 = int_to_ptr.vmem [resolvable:$true] %s19_s26 }
  0x11   :  { %s2408_s27 = scalar_lea.vmem %s20_s26, 4096  ;;  %p2413_p6 = scmp.lt.s32.totalorder %s20_s26, %s20_s26 }
  0x12   :  { %p2409_p5 = scmp.ne.s32.totalorder %s20_s26, %s2408_s27  ;;  %p2414_p7 = scmp.lt.s32.totalorder %s2408_s27, %s2408_s27 }
  0x14   :  { %p2415_p8 = por %p2414_p7, %p2413_p6 }
  0x16   :  { %p2416_p9 = pnand %p2415_p8, %p2409_p5 }
  0x18   :  { %2419 = shalt.err (!%p2416_p9)
}
  0x19   :  { %s2492_s28 = smov 128   ;;  %s2493_s29 = smov 8  }
  0x1a   :  { %25 = dma.hbm_to_vmem [thread:$0]  %s3012_s0, 4096, %s20_s26, [#allocation3], %s2492_s28, %s2492_s28, %s2493_s29  }
  0x1b   :  { %s2494_s1 = smov [#allocation7]   ;;  %s2495_s8 = smov [#allocation8]  }
  0x1c   :  { %s44_s7 = sshll.u32 %s2494_s1, 4  ;;  %s53_s9 = sshll.u32 %s2495_s8, 4  ;;  %s45_s7 = int_to_ptr.vmem [resolvable:$true] %s44_s7  ;;  %s54_s9 = int_to_ptr.vmem [resolvable:$true] %s53_s9 }
  0x1d   :  { %s2428_s10 = scalar_lea.vmem %s45_s7, 64  ;;  %p2433_p11 = scmp.lt.s32.totalorder %s45_s7, %s45_s7 }
  0x1e   :  { %p2429_p10 = scmp.ne.s32.totalorder %s45_s7, %s2428_s10  ;;  %p2434_p12 = scmp.lt.s32.totalorder %s2428_s10, %s2428_s10 }
  0x20   :  { %p2435_p13 = por %p2434_p12, %p2433_p11 }
  0x22   :  { %p2436_p0 = pnand %p2435_p13, %p2429_p10 }
  0x24   :  { %2439 = shalt.err (!%p2436_p0)
}
  0x25   :  { %47 = dma.hbm_to_vmem [thread:$0]  %s3014_s2, 64, %s45_s7, [#allocation6]  }
  0x26   :  { %s2448_s13 = scalar_lea.vmem %s54_s9, 4096  ;;  %p2453_p2 = scmp.lt.s32.totalorder %s54_s9, %s54_s9 }
  0x27   :  { %p2449_p1 = scmp.ne.s32.totalorder %s54_s9, %s2448_s13  ;;  %p2454_p3 = scmp.lt.s32.totalorder %s2448_s13, %s2448_s13 }
  0x29   :  { %p2455_p4 = por %p2454_p3, %p2453_p2 }
  0x2b   :  { %p2456_p5 = pnand %p2455_p4, %p2449_p1 }
  0x2d   :  { %2459 = shalt.err (!%p2456_p5)
}
  0x2e   :  { %s2496_s0 = smov 64   ;;  %s2497_s14 = smov 4  }
  0x2f   :  { %59 = dma.hbm_to_vmem [thread:$0]  %s3015_s3, 4096, %s54_s9, [#allocation9], %s2496_s0, %s2496_s0, %s2497_s14  }
  0x30   :  { %2480 = dma.done.wait [#allocation3], 4096  }
  0x31   :  { %2481 = vsyncadd [#allocation3], 4294963200 }
  0x32   :  { %2482 = dma.done.wait [#allocation6], 4160  }
  0x33   :  { %2483 = vsyncadd [#allocation6], 4294963136 }
  0x34   :  { %2484 = dma.done.wait [#allocation9], 4096  }
  0x35   :  { %2485 = vsyncadd [#allocation9], 4294963200  ;;  %v2498_v0 = vmov 0   ;;  %v2172_v1 = vld [vmem:[#allocation5 + $0xe4] ss:$16 sps:$4 sm:$0xff]   ;;  %v76_v34 = vld [vmem:[#allocation2 + $0x8] sm:$0xff] }
  0x36   :  { %369 = vmatprep.mubr.bf16.mxu0 %v2498_v0  ;;  %562 = vmatprep.mubr.bf16.mxu1 %v2498_v0  ;;  %v2174_v2 = vld [vmem:[#allocation5 + $0xec] ss:$16 sps:$4 sm:$0xff]   ;;  %v2176_v3 = vld [vmem:[#allocation5 + $0xe0] ss:$16 sps:$4 sm:$0xff]   ;;  %v2177_v4 = vld [vmem:[#allocation5 + $0xe8] ss:$16 sps:$4 sm:$0xff]  }
  0x37   :  { %337 = vmatprep.subr.bf16.mxu0 %v2172_v1  ;;  %530 = vmatprep.subr.bf16.mxu1 %v2174_v2  ;;  %v2178_v5 = vld [vmem:[#allocation5 + $0xc4] ss:$16 sps:$4 sm:$0xff]   ;;  %v2180_v6 = vld [vmem:[#allocation5 + $0xcc] ss:$16 sps:$4 sm:$0xff]   ;;  %v2182_v7 = vld [vmem:[#allocation5 + $0xc0] ss:$16 sps:$4 sm:$0xff]  }
  0x38   :  { %338 = vmatpush1.bf16.msra.mxu0 %v2176_v3  ;;  %531 = vmatpush1.bf16.msra.mxu1 %v2177_v4  ;;  %v2183_v8 = vld [vmem:[#allocation5 + $0xc8] ss:$16 sps:$4 sm:$0xff]   ;;  %v2184_v9 = vld [vmem:[#allocation5 + $0xa4] ss:$16 sps:$4 sm:$0xff]   ;;  %v2186_v10 = vld [vmem:[#allocation5 + $0xac] ss:$16 sps:$4 sm:$0xff]  }
  0x39   :  { %339 = vmatprep.subr.bf16.mxu0 %v2178_v5  ;;  %532 = vmatprep.subr.bf16.mxu1 %v2180_v6  ;;  %v2188_v11 = vld [vmem:[#allocation5 + $0xa0] ss:$16 sps:$4 sm:$0xff]   ;;  %v2189_v12 = vld [vmem:[#allocation5 + $0xa8] ss:$16 sps:$4 sm:$0xff]   ;;  %v2190_v13 = vld [vmem:[#allocation5 + $0x84] ss:$16 sps:$4 sm:$0xff]  }
  0x3a   :  { %v2192_v14 = vld [vmem:[#allocation5 + $0x8c] ss:$16 sps:$4 sm:$0xff]   ;;  %v2194_v15 = vld [vmem:[#allocation5 + $0x80] ss:$16 sps:$4 sm:$0xff]   ;;  %v2195_v16 = vld [vmem:[#allocation5 + $0x88] ss:$16 sps:$4 sm:$0xff]  }
  0x3b   :  { %v2196_v17 = vld [vmem:[#allocation5 + $0x64] ss:$16 sps:$4 sm:$0xff]   ;;  %v2198_v18 = vld [vmem:[#allocation5 + $0x6c] ss:$16 sps:$4 sm:$0xff]   ;;  %v2200_v19 = vld [vmem:[#allocation5 + $0x60] ss:$16 sps:$4 sm:$0xff]  }
  0x3c   :  { %340 = vmatpush1.bf16.msra.mxu0 %v2182_v7  ;;  %533 = vmatpush1.bf16.msra.mxu1 %v2183_v8  ;;  %v2201_v20 = vld [vmem:[#allocation5 + $0x68] ss:$16 sps:$4 sm:$0xff]   ;;  %v2202_v21 = vld [vmem:[#allocation5 + $0x44] ss:$16 sps:$4 sm:$0xff]   ;;  %v2204_v22 = vld [vmem:[#allocation5 + $0x4c] ss:$16 sps:$4 sm:$0xff]  }
  0x3d   :  { %341 = vmatprep.subr.bf16.mxu0 %v2184_v9  ;;  %534 = vmatprep.subr.bf16.mxu1 %v2186_v10  ;;  %v2206_v23 = vld [vmem:[#allocation5 + $0x40] ss:$16 sps:$4 sm:$0xff]   ;;  %v2207_v24 = vld [vmem:[#allocation5 + $0x48] ss:$16 sps:$4 sm:$0xff]   ;;  %v2208_v25 = vld [vmem:[#allocation5 + $0x24] ss:$16 sps:$4 sm:$0xff]  }
  0x3e   :  { %v2210_v26 = vld [vmem:[#allocation5 + $0x2c] ss:$16 sps:$4 sm:$0xff]   ;;  %v2212_v27 = vld [vmem:[#allocation5 + $0x20] ss:$16 sps:$4 sm:$0xff]   ;;  %v2213_v28 = vld [vmem:[#allocation5 + $0x28] ss:$16 sps:$4 sm:$0xff]  }
  0x3f   :  { %v2214_v29 = vld [vmem:[#allocation5 + $0x4] ss:$16 sps:$4 sm:$0xff]   ;;  %v2216_v30 = vld [vmem:[#allocation5 + $0xc] ss:$16 sps:$4 sm:$0xff]   ;;  %v2218_v31 = vld [vmem:[#allocation5] ss:$16 sps:$4 sm:$0xff]  }
  0x40   :  { %342 = vmatpush1.bf16.msra.mxu0 %v2188_v11  ;;  %535 = vmatpush1.bf16.msra.mxu1 %v2189_v12  ;;  %v2219_v32 = vld [vmem:[#allocation5 + $0x8] ss:$16 sps:$4 sm:$0xff]   ;;  %v75_v33 = vld [vmem:[#allocation2] sm:$0xff]  ;;  %v77_v41 = vld [vmem:[#allocation2 + $0x10] sm:$0xff] }
  0x41   :  { %343 = vmatprep.subr.bf16.mxu0 %v2190_v13  ;;  %536 = vmatprep.subr.bf16.mxu1 %v2192_v14  ;;  %v2220_v35 = vld [vmem:[#allocation8 + $0x78] sm:$0xff]   ;;  %v107_v37 = vpack.c.bf16 %v76_v34, %v75_v33  ;;  %v2224_v40 = vld [vmem:[#allocation8 + $0x70] sm:$0xff]   ;;  %v2228_v47 = vld [vmem:[#allocation8 + $0x68] sm:$0xff]  }
  0x42   :  { %v2222_v36 = vld [vmem:[#allocation8 + $0xf8] sm:$0xff]   ;;  %v2225_v43 = vld [vmem:[#allocation8 + $0x30] sm:$0xff]   ;;  %v2229_v48 = vld [vmem:[#allocation8 + $0x28] sm:$0xff]  }
  0x43   :  { %v2221_v38 = vld [vmem:[#allocation8 + $0x38] sm:$0xff]   ;;  %v2226_v44 = vld [vmem:[#allocation8 + $0xf0] sm:$0xff]   ;;  %v2230_v49 = vld [vmem:[#allocation8 + $0xe8] sm:$0xff]  }
  0x44   :  { %344 = vmatpush1.bf16.msra.mxu0 %v2194_v15  ;;  %537 = vmatpush1.bf16.msra.mxu1 %v2195_v16  ;;  %v2223_v39 = vld [vmem:[#allocation8 + $0xb8] sm:$0xff]   ;;  %v2227_v45 = vld [vmem:[#allocation8 + $0xb0] sm:$0xff]   ;;  %v80_v51 = vld [vmem:[#allocation2 + $0x28] sm:$0xff] }
  0x45   :  { %345 = vmatprep.subr.bf16.mxu0 %v2196_v17  ;;  %538 = vmatprep.subr.bf16.mxu1 %v2198_v18  ;;  %v78_v42 = vld [vmem:[#allocation2 + $0x18] sm:$0xff]  ;;  %v79_v50 = vld [vmem:[#allocation2 + $0x20] sm:$0xff]  ;;  %v2231_v52 = vld [vmem:[#allocation8 + $0xa8] sm:$0xff]  }
  0x46   :  { %v108_v46 = vpack.c.bf16 %v78_v42, %v77_v41  ;;  %v2232_v53 = vld [vmem:[#allocation8 + $0x60] sm:$0xff]   ;;  %v109_v56 = vpack.c.bf16 %v80_v51, %v79_v50  ;;  %v2236_v58 = vld [vmem:[#allocation8 + $0x58] sm:$0xff]   ;;  %v81_v60 = vld [vmem:[#allocation2 + $0x30] sm:$0xff]  ;;  %v157_v50 = vlaneseq }
  0x47   :  { %v2233_v54 = vld [vmem:[#allocation8 + $0x20] sm:$0xff]   ;;  %v2237_v59 = vld [vmem:[#allocation8 + $0x18] sm:$0xff]   ;;  %v2240_v1 = vld [vmem:[#allocation8 + $0x50] sm:$0xff]  }
  0x48   :  { %346 = vmatpush1.bf16.msra.mxu0 %v2200_v19  ;;  %539 = vmatpush1.bf16.msra.mxu1 %v2201_v20  ;;  %v2234_v55 = vld [vmem:[#allocation8 + $0xe0] sm:$0xff]   ;;  %v82_v61 = vld [vmem:[#allocation2 + $0x38] sm:$0xff]  ;;  %v2244_v6 = vld [vmem:[#allocation8 + $0x48] sm:$0xff]   ;;  %v158_v51 = vshrl.u32 %v157_v50, 7 }
  0x49   :  { %347 = vmatprep.subr.bf16.mxu0 %v2202_v21  ;;  %540 = vmatprep.subr.bf16.mxu1 %v2204_v22  ;;  %v2235_v57 = vld [vmem:[#allocation8 + $0xa0] sm:$0xff]   ;;  %v2238_v62 = vld [vmem:[#allocation8 + $0xd8] sm:$0xff]   ;;  %v2241_v2 = vld [vmem:[#allocation8 + $0x10] sm:$0xff]   ;;  %v110_v4 = vpack.c.bf16 %v82_v61, %v81_v60 }
  0x4a   :  { %v2239_v63 = vld [vmem:[#allocation8 + $0x98] sm:$0xff]   ;;  %v2242_v3 = vld [vmem:[#allocation8 + $0xd0] sm:$0xff]   ;;  %v2245_v7 = vld [vmem:[#allocation8 + $0x8] sm:$0xff]  }
  0x4b   :  { %v2243_v5 = vld [vmem:[#allocation8 + $0x90] sm:$0xff]   ;;  %v83_v8 = vld [vmem:[#allocation2 + $0x40] sm:$0xff]  ;;  %v84_v9 = vld [vmem:[#allocation2 + $0x48] sm:$0xff] }
  0x4c   :  { %348 = vmatpush1.bf16.msra.mxu0 %v2206_v23  ;;  %541 = vmatpush1.bf16.msra.mxu1 %v2207_v24  ;;  %v2246_v10 = vld [vmem:[#allocation8 + $0xc8] sm:$0xff]   ;;  %v2248_v12 = vld [vmem:[#allocation8 + $0x40] sm:$0xff]   ;;  %v111_v15 = vpack.c.bf16 %v84_v9, %v83_v8  ;;  %v86_v17 = vld [vmem:[#allocation2 + $0x58] sm:$0xff] }
  0x4d   :  { %349 = vmatprep.subr.bf16.mxu0 %v2208_v25  ;;  %542 = vmatprep.subr.bf16.mxu1 %v2210_v26  ;;  %v2247_v11 = vld [vmem:[#allocation8 + $0x88] sm:$0xff]   ;;  %v2249_v13 = vld [vmem:[#allocation8] sm:$0xff]   ;;  %v90_v23 = vld [vmem:[#allocation2 + $0x78] sm:$0xff] }
  0x4e   :  { %v2250_v14 = vld [vmem:[#allocation8 + $0xc0] sm:$0xff]   ;;  %v85_v16 = vld [vmem:[#allocation2 + $0x50] sm:$0xff]  ;;  %v102_v42 = vld [vmem:[#allocation2 + $0xd8] sm:$0xff] }
  0x4f   :  { %v112_v18 = vpack.c.bf16 %v86_v17, %v85_v16  ;;  %v87_v19 = vld [vmem:[#allocation2 + $0x60] sm:$0xff]  ;;  %v88_v20 = vld [vmem:[#allocation2 + $0x68] sm:$0xff]  ;;  %v89_v22 = vld [vmem:[#allocation2 + $0x70] sm:$0xff] }
  0x50   :  { %350 = vmatpush1.bf16.msra.mxu0 %v2212_v27  ;;  %543 = vmatpush1.bf16.msra.mxu1 %v2213_v28  ;;  %v113_v21 = vpack.c.bf16 %v88_v20, %v87_v19  ;;  %v114_v24 = vpack.c.bf16 %v90_v23, %v89_v22  ;;  %v91_v25 = vld [vmem:[#allocation2 + $0x80] sm:$0xff]  ;;  %v92_v26 = vld [vmem:[#allocation2 + $0x88] sm:$0xff]  ;;  %v93_v28 = vld [vmem:[#allocation2 + $0x90] sm:$0xff] }
  0x51   :  { %351 = vmatprep.subr.bf16.mxu0 %v2214_v29  ;;  %544 = vmatprep.subr.bf16.mxu1 %v2216_v30  ;;  %v115_v27 = vpack.c.bf16 %v92_v26, %v91_v25  ;;  %v94_v29 = vld [vmem:[#allocation2 + $0x98] sm:$0xff]  ;;  %v2251_v30 = vld [vmem:[#allocation8 + $0x80] sm:$0xff]   ;;  %v101_v41 = vld [vmem:[#allocation2 + $0xd0] sm:$0xff] }
  0x52   :  { %v96_v33 = vld [vmem:[#allocation2 + $0xa8] sm:$0xff] }
  0x54   :  { %352 = vmatpush1.bf16.msra.mxu0 %v2218_v31  ;;  %545 = vmatpush1.bf16.msra.mxu1 %v2219_v32  ;;  %v116_v31 = vpack.c.bf16 %v94_v29, %v93_v28  ;;  %v95_v32 = vld [vmem:[#allocation2 + $0xa0] sm:$0xff] }
  0x55   :  { %1936 = vmatprep.subr.bf16.mxu0 %v2220_v35  ;;  %2048 = vmatprep.subr.bf16.mxu1 %v2222_v36  ;;  %v117_v34 = vpack.c.bf16 %v96_v33, %v95_v32  ;;  %v97_v35 = vld [vmem:[#allocation2 + $0xb0] sm:$0xff]  ;;  %v98_v36 = vld [vmem:[#allocation2 + $0xb8] sm:$0xff] }
  0x57   :  { %370 = vmatmul.mubr.bf16.vlgmr.msra.gmra.mxu0 %v107_v37  ;;  %563 = vmatmul.mubr.bf16.vlgmr.msra.gmra.mxu1 %v107_v37  ;;  %v118_v37 = vpack.c.bf16 %v98_v36, %v97_v35 }
  0x58   :  { %379 = vmatprep.mubr.bf16.mxu0 %v2498_v0  ;;  %572 = vmatprep.mubr.bf16.mxu1 %v2498_v0 }
  0x59   :  { %1937 = vmatpush3.bf16.msra.mxu0 %v2221_v38  ;;  %2049 = vmatpush3.bf16.msra.mxu1 %v2223_v39  ;;  %v99_v38 = vld [vmem:[#allocation2 + $0xc0] sm:$0xff]  ;;  %v100_v39 = vld [vmem:[#allocation2 + $0xc8] sm:$0xff] }
  0x5a   :  { %1938 = vmatprep.subr.bf16.mxu0 %v2224_v40  ;;  %2050 = vmatprep.subr.bf16.mxu1 %v2226_v44  ;;  %v119_v40 = vpack.c.bf16 %v100_v39, %v99_v38  ;;  %v103_v44 = vld [vmem:[#allocation2 + $0xe0] sm:$0xff] }
  0x5d   :  { %1939 = vmatpush3.bf16.msra.mxu0 %v2225_v43  ;;  %2051 = vmatpush3.bf16.msra.mxu1 %v2227_v45  ;;  %v120_v43 = vpack.c.bf16 %v102_v42, %v101_v41  ;;  %v104_v45 = vld [vmem:[#allocation2 + $0xe8] sm:$0xff] }
  0x5e   :  { %1940 = vmatprep.subr.bf16.mxu0 %v2228_v47  ;;  %2052 = vmatprep.subr.bf16.mxu1 %v2230_v49  ;;  %v105_v47 = vld [vmem:[#allocation2 + $0xf0] sm:$0xff] }
  0x5f   :  { %380 = vmatmul.mubr.bf16.gmra.mxu0 %v108_v46  ;;  %573 = vmatmul.mubr.bf16.gmra.mxu1 %v108_v46  ;;  %v121_v46 = vpack.c.bf16 %v104_v45, %v103_v44 }
  0x60   :  { %389 = vmatprep.mubr.bf16.mxu0 %v2498_v0  ;;  %582 = vmatprep.mubr.bf16.mxu1 %v2498_v0 }
  0x61   :  { %1941 = vmatpush3.bf16.msra.mxu0 %v2229_v48  ;;  %2053 = vmatpush3.bf16.msra.mxu1 %v2231_v52  ;;  %v106_v48 = vld [vmem:[#allocation2 + $0xf8] sm:$0xff]  ;;  %v163_v52 = vsub.s32 1, %v158_v51 }
  0x62   :  { %1942 = vmatprep.subr.bf16.mxu0 %v2232_v53  ;;  %2054 = vmatprep.subr.bf16.mxu1 %v2234_v55  ;;  %v122_v49 = vpack.c.bf16 %v106_v48, %v105_v47  ;;  %v171_v53 = vsub.s32 3, %v158_v51  ;;  %v167_v55 = vsub.s32 2, %v158_v51 }
  0x65   :  { %1943 = vmatpush3.bf16.msra.mxu0 %v2233_v54  ;;  %2055 = vmatpush3.bf16.msra.mxu1 %v2235_v57  ;;  %v159_v54 = vsub.s32 0, %v158_v51 }
  0x66   :  { %1944 = vmatprep.subr.bf16.mxu0 %v2236_v58  ;;  %2056 = vmatprep.subr.bf16.mxu1 %v2238_v62 }
  0x67   :  { %390 = vmatmul.mubr.bf16.gmra.mxu0 %v109_v56  ;;  %583 = vmatmul.mubr.bf16.gmra.mxu1 %v109_v56  ;;  %v155_v56 = vld [vmem:[#allocation7] sm:$0xf] }
  0x68   :  { %399 = vmatprep.mubr.bf16.mxu0 %v2498_v0  ;;  %592 = vmatprep.mubr.bf16.mxu1 %v2498_v0  ;;  %v2579_v60 = vrot.slane %v155_v56, %v171_v53  ;;  %v2581_v61 = vrot.slane %v155_v56, %v159_v54 }
  0x69   :  { %1945 = vmatpush3.bf16.msra.mxu0 %v2237_v59  ;;  %2057 = vmatpush3.bf16.msra.mxu1 %v2239_v63  ;;  %v2577_v59 = vrot.slane %v155_v56, %v163_v52 }
  0x6a   :  { %1946 = vmatprep.subr.bf16.mxu0 %v2240_v1  ;;  %2058 = vmatprep.subr.bf16.mxu1 %v2242_v3 }
  0x6d   :  { %1947 = vmatpush3.bf16.msra.mxu0 %v2241_v2  ;;  %2059 = vmatpush3.bf16.msra.mxu1 %v2243_v5 }
  0x6e   :  { %1948 = vmatprep.subr.bf16.mxu0 %v2244_v6  ;;  %2060 = vmatprep.subr.bf16.mxu1 %v2246_v10 }
  0x6f   :  { %400 = vmatmul.mubr.bf16.gmra.mxu0 %v110_v4  ;;  %593 = vmatmul.mubr.bf16.gmra.mxu1 %v110_v4 }
  0x70   :  { %409 = vmatprep.mubr.bf16.mxu0 %v2498_v0  ;;  %602 = vmatprep.mubr.bf16.mxu1 %v2498_v0 }
  0x71   :  { %1949 = vmatpush3.bf16.msra.mxu0 %v2245_v7  ;;  %2061 = vmatpush3.bf16.msra.mxu1 %v2247_v11 }
  0x72   :  { %1950 = vmatprep.subr.bf16.mxu0 %v2248_v12  ;;  %2062 = vmatprep.subr.bf16.mxu1 %v2250_v14 }
  0x75   :  { %1951 = vmatpush3.bf16.msra.mxu0 %v2249_v13  ;;  %2063 = vmatpush3.bf16.msra.mxu1 %v2251_v30 }
  0x77   :  { %410 = vmatmul.mubr.bf16.gmra.mxu0 %v111_v15  ;;  %603 = vmatmul.mubr.bf16.gmra.mxu1 %v111_v15 }
  0x78   :  { %419 = vmatprep.mubr.bf16.mxu0 %v2498_v0  ;;  %612 = vmatprep.mubr.bf16.mxu1 %v2498_v0 }
  0x7f   :  { %420 = vmatmul.mubr.bf16.gmra.mxu0 %v112_v18  ;;  %613 = vmatmul.mubr.bf16.gmra.mxu1 %v112_v18 }
  0x80   :  { %429 = vmatprep.mubr.bf16.mxu0 %v2498_v0  ;;  %622 = vmatprep.mubr.bf16.mxu1 %v2498_v0 }
  0x87   :  { %430 = vmatmul.mubr.bf16.gmra.mxu0 %v113_v21  ;;  %623 = vmatmul.mubr.bf16.gmra.mxu1 %v113_v21 }
  0x88   :  { %439 = vmatprep.mubr.bf16.mxu0 %v2498_v0  ;;  %632 = vmatprep.mubr.bf16.mxu1 %v2498_v0 }
  0x8f   :  { %440 = vmatmul.mubr.bf16.gmra.mxu0 %v114_v24  ;;  %633 = vmatmul.mubr.bf16.gmra.mxu1 %v114_v24 }
  0x90   :  { %449 = vmatprep.mubr.bf16.mxu0 %v2498_v0  ;;  %642 = vmatprep.mubr.bf16.mxu1 %v2498_v0 }
  0x97   :  { %450 = vmatmul.mubr.bf16.gmra.mxu0 %v115_v27  ;;  %643 = vmatmul.mubr.bf16.gmra.mxu1 %v115_v27 }
  0x98   :  { %459 = vmatprep.mubr.bf16.mxu0 %v2498_v0  ;;  %652 = vmatprep.mubr.bf16.mxu1 %v2498_v0 }
  0x9f   :  { %460 = vmatmul.mubr.bf16.gmra.mxu0 %v116_v31  ;;  %653 = vmatmul.mubr.bf16.gmra.mxu1 %v116_v31 }
  0xa0   :  { %469 = vmatprep.mubr.bf16.mxu0 %v2498_v0  ;;  %662 = vmatprep.mubr.bf16.mxu1 %v2498_v0 }
  0xa7   :  { %470 = vmatmul.mubr.bf16.gmra.mxu0 %v117_v34  ;;  %663 = vmatmul.mubr.bf16.gmra.mxu1 %v117_v34 }
  0xa8   :  { %479 = vmatprep.mubr.bf16.mxu0 %v2498_v0  ;;  %672 = vmatprep.mubr.bf16.mxu1 %v2498_v0 }
  0xaf   :  { %480 = vmatmul.mubr.bf16.gmra.mxu0 %v118_v37  ;;  %673 = vmatmul.mubr.bf16.gmra.mxu1 %v118_v37 }
  0xb0   :  { %489 = vmatprep.mubr.bf16.mxu0 %v2498_v0  ;;  %682 = vmatprep.mubr.bf16.mxu1 %v2498_v0 }
  0xb7   :  { %490 = vmatmul.mubr.bf16.gmra.mxu0 %v119_v40  ;;  %683 = vmatmul.mubr.bf16.gmra.mxu1 %v119_v40 }
  0xb8   :  { %499 = vmatprep.mubr.bf16.mxu0 %v2498_v0  ;;  %692 = vmatprep.mubr.bf16.mxu1 %v2498_v0 }
  0xbf   :  { %500 = vmatmul.mubr.bf16.gmra.mxu0 %v120_v43  ;;  %693 = vmatmul.mubr.bf16.gmra.mxu1 %v120_v43 }
  0xc0   :  { %509 = vmatprep.mubr.bf16.mxu0 %v2498_v0  ;;  %702 = vmatprep.mubr.bf16.mxu1 %v2498_v0 }
  0xc7   :  { %510 = vmatmul.mubr.bf16.gmra.mxu0 %v121_v46  ;;  %703 = vmatmul.mubr.bf16.gmra.mxu1 %v121_v46 }
  0xc8   :  { %519 = vmatprep.mubr.bf16.mxu0 %v2498_v0  ;;  %712 = vmatprep.mubr.bf16.mxu1 %v2498_v0  ;;  %v2583_v0 = vrot.slane %v155_v56, %v167_v55 }
  0xcf   :  { %520 = vmatmul.mubr.bf16.gmra.mxu0 %v122_v49  ;;  %713 = vmatmul.mubr.bf16.gmra.mxu1 %v122_v49 }
 0x117   :  { %v371_v57 = vpop.f32.mrf.mxu0  ;;  %v564_v58 = vpop.f32.mrf.mxu1 }
 0x118   :  { %v372_v7 = vadd.f32 %v371_v57, %v2581_v61  ;;  %v565_v8 = vadd.f32 %v564_v58, %v2583_v0 }
 0x119   :  { %v373_v62 = vpop.f32.mrf.mxu0  ;;  %v566_v63 = vpop.f32.mrf.mxu1 }
 0x11a   :  { %v374_v3 = vadd.f32 %v373_v62, %v2577_v59  ;;  %v567_v4 = vadd.f32 %v566_v63, %v2579_v60  ;;  %v723_v21 = vmax.f32 %v372_v7, 0.0  ;;  %v725_v22 = vmax.f32 %v565_v8, 0.0 }
 0x11b   :  { %v375_v1 = vpop.f32.mrf.mxu0  ;;  %v568_v2 = vpop.f32.mrf.mxu1 }
 0x11c   :  { %v376_v5 = vadd.f32 %v375_v1, %v2581_v61  ;;  %v569_v6 = vadd.f32 %v568_v2, %v2583_v0  ;;  %v724_v17 = vmax.f32 %v374_v3, 0.0  ;;  %v726_v18 = vmax.f32 %v567_v4, 0.0 }
 0x11d   :  { %v377_v9 = vpop.f32.mrf.mxu0  ;;  %v570_v10 = vpop.f32.mrf.mxu1 }
 0x11e   :  { %v378_v11 = vadd.f32 %v377_v9, %v2577_v59  ;;  %v571_v12 = vadd.f32 %v570_v10, %v2579_v60  ;;  %v727_v13 = vmax.f32 %v376_v5, 0.0  ;;  %v729_v14 = vmax.f32 %v569_v6, 0.0 }
 0x11f   :  { %v381_v15 = vpop.f32.mrf.mxu0  ;;  %v574_v16 = vpop.f32.mrf.mxu1 }
 0x120   :  { %v728_v19 = vmax.f32 %v378_v11, 0.0  ;;  %v730_v20 = vmax.f32 %v571_v12, 0.0  ;;  %v851_v27 = vpack.c.bf16 %v727_v13, %v723_v21  ;;  %v853_v28 = vpack.c.bf16 %v729_v14, %v725_v22 }
 0x121   :  { %v383_v23 = vpop.f32.mrf.mxu0  ;;  %v576_v24 = vpop.f32.mrf.mxu1  ;;  %v382_v35 = vadd.f32 %v381_v15, %v2581_v61  ;;  %v575_v36 = vadd.f32 %v574_v16, %v2583_v0 }
 0x122   :  { %v852_v25 = vpack.c.bf16 %v728_v19, %v724_v17  ;;  %v854_v26 = vpack.c.bf16 %v730_v20, %v726_v18  ;;  %v384_v29 = vadd.f32 %v383_v23, %v2577_v59  ;;  %v577_v32 = vadd.f32 %v576_v24, %v2579_v60 }
 0x123   :  { %v385_v30 = vpop.f32.mrf.mxu0  ;;  %v578_v31 = vpop.f32.mrf.mxu1  ;;  %v731_v49 = vmax.f32 %v382_v35, 0.0  ;;  %v733_v50 = vmax.f32 %v575_v36, 0.0 }
 0x124   :  { %v386_v33 = vadd.f32 %v385_v30, %v2581_v61  ;;  %v579_v34 = vadd.f32 %v578_v31, %v2583_v0  ;;  %1210 = vmatprep.mubr.bf16.mxu0 %v852_v25  ;;  %1371 = vmatprep.mubr.bf16.mxu1 %v854_v26  ;;  %v732_v45 = vmax.f32 %v384_v29, 0.0  ;;  %v734_v46 = vmax.f32 %v577_v32, 0.0 }
 0x125   :  { %v387_v37 = vpop.f32.mrf.mxu0  ;;  %v580_v38 = vpop.f32.mrf.mxu1  ;;  %1211 = vmatmul.mubr.bf16.vlgmr.msra.gmra.mxu0 %v851_v27  ;;  %1372 = vmatmul.mubr.bf16.vlgmr.msra.gmra.mxu1 %v853_v28 }
 0x126   :  { %v388_v39 = vadd.f32 %v387_v37, %v2577_v59  ;;  %v581_v40 = vadd.f32 %v580_v38, %v2579_v60  ;;  %v735_v41 = vmax.f32 %v386_v33, 0.0  ;;  %v737_v42 = vmax.f32 %v579_v34, 0.0 }
 0x127   :  { %v391_v43 = vpop.f32.mrf.mxu0  ;;  %v584_v44 = vpop.f32.mrf.mxu1 }
 0x128   :  { %v736_v47 = vmax.f32 %v388_v39, 0.0  ;;  %v738_v48 = vmax.f32 %v581_v40, 0.0  ;;  %v855_v55 = vpack.c.bf16 %v735_v41, %v731_v49  ;;  %v857_v56 = vpack.c.bf16 %v737_v42, %v733_v50 }
 0x129   :  { %v393_v51 = vpop.f32.mrf.mxu0  ;;  %v586_v52 = vpop.f32.mrf.mxu1  ;;  %v392_v3 = vadd.f32 %v391_v43, %v2581_v61  ;;  %v585_v4 = vadd.f32 %v584_v44, %v2583_v0 }
 0x12a   :  { %v856_v53 = vpack.c.bf16 %v736_v47, %v732_v45  ;;  %v858_v54 = vpack.c.bf16 %v738_v48, %v734_v46  ;;  %v394_v57 = vadd.f32 %v393_v51, %v2577_v59  ;;  %v587_v63 = vadd.f32 %v586_v52, %v2579_v60 }
 0x12b   :  { %v395_v58 = vpop.f32.mrf.mxu0  ;;  %v588_v62 = vpop.f32.mrf.mxu1  ;;  %v739_v17 = vmax.f32 %v392_v3, 0.0  ;;  %v741_v18 = vmax.f32 %v585_v4, 0.0 }
 0x12c   :  { %v396_v1 = vadd.f32 %v395_v58, %v2581_v61  ;;  %v589_v2 = vadd.f32 %v588_v62, %v2583_v0  ;;  %1218 = vmatprep.mubr.bf16.mxu0 %v856_v53  ;;  %1379 = vmatprep.mubr.bf16.mxu1 %v858_v54  ;;  %v740_v13 = vmax.f32 %v394_v57, 0.0  ;;  %v742_v14 = vmax.f32 %v587_v63, 0.0 }
 0x12d   :  { %v397_v5 = vpop.f32.mrf.mxu0  ;;  %v590_v6 = vpop.f32.mrf.mxu1  ;;  %1219 = vmatmul.mubr.bf16.gmra.mxu0 %v855_v55  ;;  %1380 = vmatmul.mubr.bf16.gmra.mxu1 %v857_v56 }
 0x12e   :  { %v398_v7 = vadd.f32 %v397_v5, %v2577_v59  ;;  %v591_v8 = vadd.f32 %v590_v6, %v2579_v60  ;;  %v743_v9 = vmax.f32 %v396_v1, 0.0  ;;  %v745_v10 = vmax.f32 %v589_v2, 0.0 }
 0x12f   :  { %v401_v11 = vpop.f32.mrf.mxu0  ;;  %v594_v12 = vpop.f32.mrf.mxu1 }
 0x130   :  { %v744_v15 = vmax.f32 %v398_v7, 0.0  ;;  %v746_v16 = vmax.f32 %v591_v8, 0.0  ;;  %v859_v23 = vpack.c.bf16 %v743_v9, %v739_v17  ;;  %v861_v24 = vpack.c.bf16 %v745_v10, %v741_v18 }
 0x131   :  { %v403_v19 = vpop.f32.mrf.mxu0  ;;  %v596_v20 = vpop.f32.mrf.mxu1  ;;  %v402_v31 = vadd.f32 %v401_v11, %v2581_v61  ;;  %v595_v32 = vadd.f32 %v594_v12, %v2583_v0 }
 0x132   :  { %v860_v21 = vpack.c.bf16 %v744_v15, %v740_v13  ;;  %v862_v22 = vpack.c.bf16 %v746_v16, %v742_v14  ;;  %v404_v25 = vadd.f32 %v403_v19, %v2577_v59  ;;  %v597_v28 = vadd.f32 %v596_v20, %v2579_v60 }
 0x133   :  { %v405_v26 = vpop.f32.mrf.mxu0  ;;  %v598_v27 = vpop.f32.mrf.mxu1  ;;  %v747_v45 = vmax.f32 %v402_v31, 0.0  ;;  %v749_v46 = vmax.f32 %v595_v32, 0.0 }
 0x134   :  { %v406_v29 = vadd.f32 %v405_v26, %v2581_v61  ;;  %v599_v30 = vadd.f32 %v598_v27, %v2583_v0  ;;  %1226 = vmatprep.mubr.bf16.mxu0 %v860_v21  ;;  %1387 = vmatprep.mubr.bf16.mxu1 %v862_v22  ;;  %v748_v41 = vmax.f32 %v404_v25, 0.0  ;;  %v750_v42 = vmax.f32 %v597_v28, 0.0 }
 0x135   :  { %v407_v33 = vpop.f32.mrf.mxu0  ;;  %v600_v34 = vpop.f32.mrf.mxu1  ;;  %1227 = vmatmul.mubr.bf16.gmra.mxu0 %v859_v23  ;;  %1388 = vmatmul.mubr.bf16.gmra.mxu1 %v861_v24 }
 0x136   :  { %v408_v35 = vadd.f32 %v407_v33, %v2577_v59  ;;  %v601_v36 = vadd.f32 %v600_v34, %v2579_v60  ;;  %v751_v37 = vmax.f32 %v406_v29, 0.0  ;;  %v753_v38 = vmax.f32 %v599_v30, 0.0 }
 0x137   :  { %v411_v39 = vpop.f32.mrf.mxu0  ;;  %v604_v40 = vpop.f32.mrf.mxu1 }
 0x138   :  { %v752_v43 = vmax.f32 %v408_v35, 0.0  ;;  %v754_v44 = vmax.f32 %v601_v36, 0.0  ;;  %v863_v51 = vpack.c.bf16 %v751_v37, %v747_v45  ;;  %v865_v52 = vpack.c.bf16 %v753_v38, %v749_v46 }
 0x139   :  { %v413_v47 = vpop.f32.mrf.mxu0  ;;  %v606_v48 = vpop.f32.mrf.mxu1  ;;  %v412_v62 = vadd.f32 %v411_v39, %v2581_v61  ;;  %v605_v63 = vadd.f32 %v604_v40, %v2583_v0 }
 0x13a   :  { %v864_v49 = vpack.c.bf16 %v752_v43, %v748_v41  ;;  %v866_v50 = vpack.c.bf16 %v754_v44, %v750_v42  ;;  %v414_v53 = vadd.f32 %v413_v47, %v2577_v59  ;;  %v607_v56 = vadd.f32 %v606_v48, %v2579_v60 }
 0x13b   :  { %v415_v54 = vpop.f32.mrf.mxu0  ;;  %v608_v55 = vpop.f32.mrf.mxu1  ;;  %v755_v13 = vmax.f32 %v412_v62, 0.0  ;;  %v757_v14 = vmax.f32 %v605_v63, 0.0 }
 0x13c   :  { %v416_v57 = vadd.f32 %v415_v54, %v2581_v61  ;;  %v609_v58 = vadd.f32 %v608_v55, %v2583_v0  ;;  %1234 = vmatprep.mubr.bf16.mxu0 %v864_v49  ;;  %1395 = vmatprep.mubr.bf16.mxu1 %v866_v50  ;;  %v756_v9 = vmax.f32 %v414_v53, 0.0  ;;  %v758_v10 = vmax.f32 %v607_v56, 0.0 }
 0x13d   :  { %v417_v1 = vpop.f32.mrf.mxu0  ;;  %v610_v2 = vpop.f32.mrf.mxu1  ;;  %1235 = vmatmul.mubr.bf16.gmra.mxu0 %v863_v51  ;;  %1396 = vmatmul.mubr.bf16.gmra.mxu1 %v865_v52 }
 0x13e   :  { %v418_v3 = vadd.f32 %v417_v1, %v2577_v59  ;;  %v611_v4 = vadd.f32 %v610_v2, %v2579_v60  ;;  %v759_v5 = vmax.f32 %v416_v57, 0.0  ;;  %v761_v6 = vmax.f32 %v609_v58, 0.0 }
 0x13f   :  { %v421_v7 = vpop.f32.mrf.mxu0  ;;  %v614_v8 = vpop.f32.mrf.mxu1 }
 0x140   :  { %v760_v11 = vmax.f32 %v418_v3, 0.0  ;;  %v762_v12 = vmax.f32 %v611_v4, 0.0  ;;  %v867_v19 = vpack.c.bf16 %v759_v5, %v755_v13  ;;  %v869_v20 = vpack.c.bf16 %v761_v6, %v757_v14 }
 0x141   :  { %v423_v15 = vpop.f32.mrf.mxu0  ;;  %v616_v16 = vpop.f32.mrf.mxu1  ;;  %v422_v27 = vadd.f32 %v421_v7, %v2581_v61  ;;  %v615_v28 = vadd.f32 %v614_v8, %v2583_v0 }
 0x142   :  { %v868_v17 = vpack.c.bf16 %v760_v11, %v756_v9  ;;  %v870_v18 = vpack.c.bf16 %v762_v12, %v758_v10  ;;  %v424_v21 = vadd.f32 %v423_v15, %v2577_v59  ;;  %v617_v24 = vadd.f32 %v616_v16, %v2579_v60 }
 0x143   :  { %v425_v22 = vpop.f32.mrf.mxu0  ;;  %v618_v23 = vpop.f32.mrf.mxu1  ;;  %v763_v41 = vmax.f32 %v422_v27, 0.0  ;;  %v765_v42 = vmax.f32 %v615_v28, 0.0 }
 0x144   :  { %v426_v25 = vadd.f32 %v425_v22, %v2581_v61  ;;  %v619_v26 = vadd.f32 %v618_v23, %v2583_v0  ;;  %1242 = vmatprep.mubr.bf16.mxu0 %v868_v17  ;;  %1403 = vmatprep.mubr.bf16.mxu1 %v870_v18  ;;  %v764_v37 = vmax.f32 %v424_v21, 0.0  ;;  %v766_v38 = vmax.f32 %v617_v24, 0.0 }
 0x145   :  { %v427_v29 = vpop.f32.mrf.mxu0  ;;  %v620_v30 = vpop.f32.mrf.mxu1  ;;  %1243 = vmatmul.mubr.bf16.gmra.mxu0 %v867_v19  ;;  %1404 = vmatmul.mubr.bf16.gmra.mxu1 %v869_v20 }
 0x146   :  { %v428_v31 = vadd.f32 %v427_v29, %v2577_v59  ;;  %v621_v32 = vadd.f32 %v620_v30, %v2579_v60  ;;  %v767_v33 = vmax.f32 %v426_v25, 0.0  ;;  %v769_v34 = vmax.f32 %v619_v26, 0.0 }
 0x147   :  { %v431_v35 = vpop.f32.mrf.mxu0  ;;  %v624_v36 = vpop.f32.mrf.mxu1 }
 0x148   :  { %v768_v39 = vmax.f32 %v428_v31, 0.0  ;;  %v770_v40 = vmax.f32 %v621_v32, 0.0  ;;  %v871_v47 = vpack.c.bf16 %v767_v33, %v763_v41  ;;  %v873_v48 = vpack.c.bf16 %v769_v34, %v765_v42 }
 0x149   :  { %v433_v43 = vpop.f32.mrf.mxu0  ;;  %v626_v44 = vpop.f32.mrf.mxu1  ;;  %v432_v55 = vadd.f32 %v431_v35, %v2581_v61  ;;  %v625_v56 = vadd.f32 %v624_v36, %v2583_v0 }
 0x14a   :  { %v872_v45 = vpack.c.bf16 %v768_v39, %v764_v37  ;;  %v874_v46 = vpack.c.bf16 %v770_v40, %v766_v38  ;;  %v434_v49 = vadd.f32 %v433_v43, %v2577_v59  ;;  %v627_v52 = vadd.f32 %v626_v44, %v2579_v60 }
 0x14b   :  { %v435_v50 = vpop.f32.mrf.mxu0  ;;  %v628_v51 = vpop.f32.mrf.mxu1  ;;  %v771_v9 = vmax.f32 %v432_v55, 0.0  ;;  %v773_v10 = vmax.f32 %v625_v56, 0.0 }
 0x14c   :  { %v436_v53 = vadd.f32 %v435_v50, %v2581_v61  ;;  %v629_v54 = vadd.f32 %v628_v51, %v2583_v0  ;;  %1250 = vmatprep.mubr.bf16.mxu0 %v872_v45  ;;  %1411 = vmatprep.mubr.bf16.mxu1 %v874_v46  ;;  %v772_v5 = vmax.f32 %v434_v49, 0.0  ;;  %v774_v6 = vmax.f32 %v627_v52, 0.0 }
 0x14d   :  { %v437_v57 = vpop.f32.mrf.mxu0  ;;  %v630_v58 = vpop.f32.mrf.mxu1  ;;  %1251 = vmatmul.mubr.bf16.gmra.mxu0 %v871_v47  ;;  %1412 = vmatmul.mubr.bf16.gmra.mxu1 %v873_v48 }
 0x14e   :  { %v438_v62 = vadd.f32 %v437_v57, %v2577_v59  ;;  %v631_v63 = vadd.f32 %v630_v58, %v2579_v60  ;;  %v775_v1 = vmax.f32 %v436_v53, 0.0  ;;  %v777_v2 = vmax.f32 %v629_v54, 0.0 }
 0x14f   :  { %v441_v3 = vpop.f32.mrf.mxu0  ;;  %v634_v4 = vpop.f32.mrf.mxu1 }
 0x150   :  { %v776_v7 = vmax.f32 %v438_v62, 0.0  ;;  %v778_v8 = vmax.f32 %v631_v63, 0.0  ;;  %v875_v15 = vpack.c.bf16 %v775_v1, %v771_v9  ;;  %v877_v16 = vpack.c.bf16 %v777_v2, %v773_v10 }
 0x151   :  { %v443_v11 = vpop.f32.mrf.mxu0  ;;  %v636_v12 = vpop.f32.mrf.mxu1  ;;  %v442_v23 = vadd.f32 %v441_v3, %v2581_v61  ;;  %v635_v24 = vadd.f32 %v634_v4, %v2583_v0 }
 0x152   :  { %v876_v13 = vpack.c.bf16 %v776_v7, %v772_v5  ;;  %v878_v14 = vpack.c.bf16 %v778_v8, %v774_v6  ;;  %v444_v17 = vadd.f32 %v443_v11, %v2577_v59  ;;  %v637_v20 = vadd.f32 %v636_v12, %v2579_v60 }
 0x153   :  { %v445_v18 = vpop.f32.mrf.mxu0  ;;  %v638_v19 = vpop.f32.mrf.mxu1  ;;  %v779_v37 = vmax.f32 %v442_v23, 0.0  ;;  %v781_v38 = vmax.f32 %v635_v24, 0.0 }
 0x154   :  { %v446_v21 = vadd.f32 %v445_v18, %v2581_v61  ;;  %v639_v22 = vadd.f32 %v638_v19, %v2583_v0  ;;  %1258 = vmatprep.mubr.bf16.mxu0 %v876_v13  ;;  %1419 = vmatprep.mubr.bf16.mxu1 %v878_v14  ;;  %v780_v33 = vmax.f32 %v444_v17, 0.0  ;;  %v782_v34 = vmax.f32 %v637_v20, 0.0 }
 0x155   :  { %v447_v25 = vpop.f32.mrf.mxu0  ;;  %v640_v26 = vpop.f32.mrf.mxu1  ;;  %1259 = vmatmul.mubr.bf16.gmra.mxu0 %v875_v15  ;;  %1420 = vmatmul.mubr.bf16.gmra.mxu1 %v877_v16 }
 0x156   :  { %v448_v27 = vadd.f32 %v447_v25, %v2577_v59  ;;  %v641_v28 = vadd.f32 %v640_v26, %v2579_v60  ;;  %v783_v29 = vmax.f32 %v446_v21, 0.0  ;;  %v785_v30 = vmax.f32 %v639_v22, 0.0 }
 0x157   :  { %v451_v31 = vpop.f32.mrf.mxu0  ;;  %v644_v32 = vpop.f32.mrf.mxu1 }
 0x158   :  { %v784_v35 = vmax.f32 %v448_v27, 0.0  ;;  %v786_v36 = vmax.f32 %v641_v28, 0.0  ;;  %v879_v43 = vpack.c.bf16 %v783_v29, %v779_v37  ;;  %v881_v44 = vpack.c.bf16 %v785_v30, %v781_v38 }
 0x159   :  { %v453_v39 = vpop.f32.mrf.mxu0  ;;  %v646_v40 = vpop.f32.mrf.mxu1  ;;  %v452_v51 = vadd.f32 %v451_v31, %v2581_v61  ;;  %v645_v52 = vadd.f32 %v644_v32, %v2583_v0 }
 0x15a   :  { %v880_v41 = vpack.c.bf16 %v784_v35, %v780_v33  ;;  %v882_v42 = vpack.c.bf16 %v786_v36, %v782_v34  ;;  %v454_v45 = vadd.f32 %v453_v39, %v2577_v59  ;;  %v647_v48 = vadd.f32 %v646_v40, %v2579_v60 }
 0x15b   :  { %v455_v46 = vpop.f32.mrf.mxu0  ;;  %v648_v47 = vpop.f32.mrf.mxu1  ;;  %v787_v5 = vmax.f32 %v452_v51, 0.0  ;;  %v789_v6 = vmax.f32 %v645_v52, 0.0 }
 0x15c   :  { %v456_v49 = vadd.f32 %v455_v46, %v2581_v61  ;;  %v649_v50 = vadd.f32 %v648_v47, %v2583_v0  ;;  %1266 = vmatprep.mubr.bf16.mxu0 %v880_v41  ;;  %1427 = vmatprep.mubr.bf16.mxu1 %v882_v42  ;;  %v788_v1 = vmax.f32 %v454_v45, 0.0  ;;  %v790_v2 = vmax.f32 %v647_v48, 0.0 }
 0x15d   :  { %v457_v53 = vpop.f32.mrf.mxu0  ;;  %v650_v54 = vpop.f32.mrf.mxu1  ;;  %1267 = vmatmul.mubr.bf16.gmra.mxu0 %v879_v43  ;;  %1428 = vmatmul.mubr.bf16.gmra.mxu1 %v881_v44 }
 0x15e   :  { %v458_v55 = vadd.f32 %v457_v53, %v2577_v59  ;;  %v651_v56 = vadd.f32 %v650_v54, %v2579_v60  ;;  %v791_v57 = vmax.f32 %v456_v49, 0.0  ;;  %v793_v58 = vmax.f32 %v649_v50, 0.0 }
 0x15f   :  { %v461_v62 = vpop.f32.mrf.mxu0  ;;  %v654_v63 = vpop.f32.mrf.mxu1 }
 0x160   :  { %v792_v3 = vmax.f32 %v458_v55, 0.0  ;;  %v794_v4 = vmax.f32 %v651_v56, 0.0  ;;  %v883_v11 = vpack.c.bf16 %v791_v57, %v787_v5  ;;  %v885_v12 = vpack.c.bf16 %v793_v58, %v789_v6 }
 0x161   :  { %v463_v7 = vpop.f32.mrf.mxu0  ;;  %v656_v8 = vpop.f32.mrf.mxu1  ;;  %v462_v19 = vadd.f32 %v461_v62, %v2581_v61  ;;  %v655_v20 = vadd.f32 %v654_v63, %v2583_v0 }
 0x162   :  { %v884_v9 = vpack.c.bf16 %v792_v3, %v788_v1  ;;  %v886_v10 = vpack.c.bf16 %v794_v4, %v790_v2  ;;  %v464_v13 = vadd.f32 %v463_v7, %v2577_v59  ;;  %v657_v16 = vadd.f32 %v656_v8, %v2579_v60 }
 0x163   :  { %v465_v14 = vpop.f32.mrf.mxu0  ;;  %v658_v15 = vpop.f32.mrf.mxu1  ;;  %v795_v33 = vmax.f32 %v462_v19, 0.0  ;;  %v797_v34 = vmax.f32 %v655_v20, 0.0 }
 0x164   :  { %v466_v17 = vadd.f32 %v465_v14, %v2581_v61  ;;  %v659_v18 = vadd.f32 %v658_v15, %v2583_v0  ;;  %1274 = vmatprep.mubr.bf16.mxu0 %v884_v9  ;;  %1435 = vmatprep.mubr.bf16.mxu1 %v886_v10  ;;  %v796_v29 = vmax.f32 %v464_v13, 0.0  ;;  %v798_v30 = vmax.f32 %v657_v16, 0.0 }
 0x165   :  { %v467_v21 = vpop.f32.mrf.mxu0  ;;  %v660_v22 = vpop.f32.mrf.mxu1  ;;  %1275 = vmatmul.mubr.bf16.gmra.mxu0 %v883_v11  ;;  %1436 = vmatmul.mubr.bf16.gmra.mxu1 %v885_v12 }
 0x166   :  { %v468_v23 = vadd.f32 %v467_v21, %v2577_v59  ;;  %v661_v24 = vadd.f32 %v660_v22, %v2579_v60  ;;  %v799_v25 = vmax.f32 %v466_v17, 0.0  ;;  %v801_v26 = vmax.f32 %v659_v18, 0.0 }
 0x167   :  { %v471_v27 = vpop.f32.mrf.mxu0  ;;  %v664_v28 = vpop.f32.mrf.mxu1 }
 0x168   :  { %v800_v31 = vmax.f32 %v468_v23, 0.0  ;;  %v802_v32 = vmax.f32 %v661_v24, 0.0  ;;  %v887_v39 = vpack.c.bf16 %v799_v25, %v795_v33  ;;  %v889_v40 = vpack.c.bf16 %v801_v26, %v797_v34 }
 0x169   :  { %v473_v35 = vpop.f32.mrf.mxu0  ;;  %v666_v36 = vpop.f32.mrf.mxu1  ;;  %v472_v47 = vadd.f32 %v471_v27, %v2581_v61  ;;  %v665_v48 = vadd.f32 %v664_v28, %v2583_v0 }
 0x16a   :  { %v888_v37 = vpack.c.bf16 %v800_v31, %v796_v29  ;;  %v890_v38 = vpack.c.bf16 %v802_v32, %v798_v30  ;;  %v474_v41 = vadd.f32 %v473_v35, %v2577_v59  ;;  %v667_v44 = vadd.f32 %v666_v36, %v2579_v60 }
 0x16b   :  { %v475_v42 = vpop.f32.mrf.mxu0  ;;  %v668_v43 = vpop.f32.mrf.mxu1  ;;  %v803_v1 = vmax.f32 %v472_v47, 0.0  ;;  %v805_v2 = vmax.f32 %v665_v48, 0.0 }
 0x16c   :  { %v476_v45 = vadd.f32 %v475_v42, %v2581_v61  ;;  %v669_v46 = vadd.f32 %v668_v43, %v2583_v0  ;;  %1282 = vmatprep.mubr.bf16.mxu0 %v888_v37  ;;  %1443 = vmatprep.mubr.bf16.mxu1 %v890_v38  ;;  %v804_v57 = vmax.f32 %v474_v41, 0.0  ;;  %v806_v58 = vmax.f32 %v667_v44, 0.0 }
 0x16d   :  { %v477_v49 = vpop.f32.mrf.mxu0  ;;  %v670_v50 = vpop.f32.mrf.mxu1  ;;  %1283 = vmatmul.mubr.bf16.gmra.mxu0 %v887_v39  ;;  %1444 = vmatmul.mubr.bf16.gmra.mxu1 %v889_v40 }
 0x16e   :  { %v478_v51 = vadd.f32 %v477_v49, %v2577_v59  ;;  %v671_v52 = vadd.f32 %v670_v50, %v2579_v60  ;;  %v807_v53 = vmax.f32 %v476_v45, 0.0  ;;  %v809_v54 = vmax.f32 %v669_v46, 0.0 }
 0x16f   :  { %v481_v55 = vpop.f32.mrf.mxu0  ;;  %v674_v56 = vpop.f32.mrf.mxu1 }
 0x170   :  { %v808_v62 = vmax.f32 %v478_v51, 0.0  ;;  %v810_v63 = vmax.f32 %v671_v52, 0.0  ;;  %v891_v7 = vpack.c.bf16 %v807_v53, %v803_v1  ;;  %v893_v8 = vpack.c.bf16 %v809_v54, %v805_v2 }
 0x171   :  { %v483_v3 = vpop.f32.mrf.mxu0  ;;  %v676_v4 = vpop.f32.mrf.mxu1  ;;  %v482_v15 = vadd.f32 %v481_v55, %v2581_v61  ;;  %v675_v16 = vadd.f32 %v674_v56, %v2583_v0 }
 0x172   :  { %v892_v5 = vpack.c.bf16 %v808_v62, %v804_v57  ;;  %v894_v6 = vpack.c.bf16 %v810_v63, %v806_v58  ;;  %v484_v9 = vadd.f32 %v483_v3, %v2577_v59  ;;  %v677_v12 = vadd.f32 %v676_v4, %v2579_v60 }
 0x173   :  { %v485_v10 = vpop.f32.mrf.mxu0  ;;  %v678_v11 = vpop.f32.mrf.mxu1  ;;  %v811_v29 = vmax.f32 %v482_v15, 0.0  ;;  %v813_v30 = vmax.f32 %v675_v16, 0.0 }
 0x174   :  { %v486_v13 = vadd.f32 %v485_v10, %v2581_v61  ;;  %v679_v14 = vadd.f32 %v678_v11, %v2583_v0  ;;  %1290 = vmatprep.mubr.bf16.mxu0 %v892_v5  ;;  %1451 = vmatprep.mubr.bf16.mxu1 %v894_v6  ;;  %v812_v25 = vmax.f32 %v484_v9, 0.0  ;;  %v814_v26 = vmax.f32 %v677_v12, 0.0 }
 0x175   :  { %v487_v17 = vpop.f32.mrf.mxu0  ;;  %v680_v18 = vpop.f32.mrf.mxu1  ;;  %1291 = vmatmul.mubr.bf16.gmra.mxu0 %v891_v7  ;;  %1452 = vmatmul.mubr.bf16.gmra.mxu1 %v893_v8 }
 0x176   :  { %v488_v19 = vadd.f32 %v487_v17, %v2577_v59  ;;  %v681_v20 = vadd.f32 %v680_v18, %v2579_v60  ;;  %v815_v21 = vmax.f32 %v486_v13, 0.0  ;;  %v817_v22 = vmax.f32 %v679_v14, 0.0 }
 0x177   :  { %v491_v23 = vpop.f32.mrf.mxu0  ;;  %v684_v24 = vpop.f32.mrf.mxu1 }
 0x178   :  { %v816_v27 = vmax.f32 %v488_v19, 0.0  ;;  %v818_v28 = vmax.f32 %v681_v20, 0.0  ;;  %v895_v35 = vpack.c.bf16 %v815_v21, %v811_v29  ;;  %v897_v36 = vpack.c.bf16 %v817_v22, %v813_v30 }
 0x179   :  { %v493_v31 = vpop.f32.mrf.mxu0  ;;  %v686_v32 = vpop.f32.mrf.mxu1  ;;  %v492_v43 = vadd.f32 %v491_v23, %v2581_v61  ;;  %v685_v44 = vadd.f32 %v684_v24, %v2583_v0 }
 0x17a   :  { %v896_v33 = vpack.c.bf16 %v816_v27, %v812_v25  ;;  %v898_v34 = vpack.c.bf16 %v818_v28, %v814_v26  ;;  %v494_v37 = vadd.f32 %v493_v31, %v2577_v59  ;;  %v687_v40 = vadd.f32 %v686_v32, %v2579_v60 }
 0x17b   :  { %v495_v38 = vpop.f32.mrf.mxu0  ;;  %v688_v39 = vpop.f32.mrf.mxu1  ;;  %v819_v57 = vmax.f32 %v492_v43, 0.0  ;;  %v821_v58 = vmax.f32 %v685_v44, 0.0 }
 0x17c   :  { %v496_v41 = vadd.f32 %v495_v38, %v2581_v61  ;;  %v689_v42 = vadd.f32 %v688_v39, %v2583_v0  ;;  %1298 = vmatprep.mubr.bf16.mxu0 %v896_v33  ;;  %1459 = vmatprep.mubr.bf16.mxu1 %v898_v34  ;;  %v820_v53 = vmax.f32 %v494_v37, 0.0  ;;  %v822_v54 = vmax.f32 %v687_v40, 0.0 }
 0x17d   :  { %v497_v45 = vpop.f32.mrf.mxu0  ;;  %v690_v46 = vpop.f32.mrf.mxu1  ;;  %1299 = vmatmul.mubr.bf16.gmra.mxu0 %v895_v35  ;;  %1460 = vmatmul.mubr.bf16.gmra.mxu1 %v897_v36 }
 0x17e   :  { %v498_v47 = vadd.f32 %v497_v45, %v2577_v59  ;;  %v691_v48 = vadd.f32 %v690_v46, %v2579_v60  ;;  %v823_v49 = vmax.f32 %v496_v41, 0.0  ;;  %v825_v50 = vmax.f32 %v689_v42, 0.0 }
 0x17f   :  { %v501_v51 = vpop.f32.mrf.mxu0  ;;  %v694_v52 = vpop.f32.mrf.mxu1 }
 0x180   :  { %v824_v55 = vmax.f32 %v498_v47, 0.0  ;;  %v826_v56 = vmax.f32 %v691_v48, 0.0  ;;  %v899_v3 = vpack.c.bf16 %v823_v49, %v819_v57  ;;  %v901_v4 = vpack.c.bf16 %v825_v50, %v821_v58 }
 0x181   :  { %v503_v62 = vpop.f32.mrf.mxu0  ;;  %v696_v63 = vpop.f32.mrf.mxu1  ;;  %v502_v11 = vadd.f32 %v501_v51, %v2581_v61  ;;  %v695_v12 = vadd.f32 %v694_v52, %v2583_v0 }
 0x182   :  { %v900_v1 = vpack.c.bf16 %v824_v55, %v820_v53  ;;  %v902_v2 = vpack.c.bf16 %v826_v56, %v822_v54  ;;  %v504_v5 = vadd.f32 %v503_v62, %v2577_v59  ;;  %v697_v8 = vadd.f32 %v696_v63, %v2579_v60 }
 0x183   :  { %v505_v6 = vpop.f32.mrf.mxu0  ;;  %v698_v7 = vpop.f32.mrf.mxu1  ;;  %v827_v25 = vmax.f32 %v502_v11, 0.0  ;;  %v829_v26 = vmax.f32 %v695_v12, 0.0 }
 0x184   :  { %v506_v9 = vadd.f32 %v505_v6, %v2581_v61  ;;  %v699_v10 = vadd.f32 %v698_v7, %v2583_v0  ;;  %1306 = vmatprep.mubr.bf16.mxu0 %v900_v1  ;;  %1467 = vmatprep.mubr.bf16.mxu1 %v902_v2  ;;  %v828_v21 = vmax.f32 %v504_v5, 0.0  ;;  %v830_v22 = vmax.f32 %v697_v8, 0.0 }
 0x185   :  { %v507_v13 = vpop.f32.mrf.mxu0  ;;  %v700_v14 = vpop.f32.mrf.mxu1  ;;  %1307 = vmatmul.mubr.bf16.gmra.mxu0 %v899_v3  ;;  %1468 = vmatmul.mubr.bf16.gmra.mxu1 %v901_v4 }
 0x186   :  { %v508_v15 = vadd.f32 %v507_v13, %v2577_v59  ;;  %v701_v16 = vadd.f32 %v700_v14, %v2579_v60  ;;  %v831_v17 = vmax.f32 %v506_v9, 0.0  ;;  %v833_v18 = vmax.f32 %v699_v10, 0.0 }
 0x187   :  { %v511_v19 = vpop.f32.mrf.mxu0  ;;  %v704_v20 = vpop.f32.mrf.mxu1 }
 0x188   :  { %v832_v23 = vmax.f32 %v508_v15, 0.0  ;;  %v834_v24 = vmax.f32 %v701_v16, 0.0  ;;  %v903_v31 = vpack.c.bf16 %v831_v17, %v827_v25  ;;  %v905_v32 = vpack.c.bf16 %v833_v18, %v829_v26 }
 0x189   :  { %v513_v27 = vpop.f32.mrf.mxu0  ;;  %v706_v28 = vpop.f32.mrf.mxu1  ;;  %v512_v39 = vadd.f32 %v511_v19, %v2581_v61  ;;  %v705_v40 = vadd.f32 %v704_v20, %v2583_v0 }
 0x18a   :  { %v904_v29 = vpack.c.bf16 %v832_v23, %v828_v21  ;;  %v906_v30 = vpack.c.bf16 %v834_v24, %v830_v22  ;;  %v514_v33 = vadd.f32 %v513_v27, %v2577_v59  ;;  %v707_v36 = vadd.f32 %v706_v28, %v2579_v60 }
 0x18b   :  { %v515_v34 = vpop.f32.mrf.mxu0  ;;  %v708_v35 = vpop.f32.mrf.mxu1  ;;  %v835_v53 = vmax.f32 %v512_v39, 0.0  ;;  %v837_v54 = vmax.f32 %v705_v40, 0.0 }
 0x18c   :  { %v516_v37 = vadd.f32 %v515_v34, %v2581_v61  ;;  %v709_v38 = vadd.f32 %v708_v35, %v2583_v0  ;;  %1314 = vmatprep.mubr.bf16.mxu0 %v904_v29  ;;  %1475 = vmatprep.mubr.bf16.mxu1 %v906_v30  ;;  %v836_v49 = vmax.f32 %v514_v33, 0.0  ;;  %v838_v50 = vmax.f32 %v707_v36, 0.0 }
 0x18d   :  { %v517_v41 = vpop.f32.mrf.mxu0  ;;  %v710_v42 = vpop.f32.mrf.mxu1  ;;  %1315 = vmatmul.mubr.bf16.gmra.mxu0 %v903_v31  ;;  %1476 = vmatmul.mubr.bf16.gmra.mxu1 %v905_v32 }
 0x18e   :  { %v518_v43 = vadd.f32 %v517_v41, %v2577_v59  ;;  %v711_v44 = vadd.f32 %v710_v42, %v2579_v60  ;;  %v839_v45 = vmax.f32 %v516_v37, 0.0  ;;  %v841_v46 = vmax.f32 %v709_v38, 0.0 }
 0x18f   :  { %v521_v47 = vpop.f32.mrf.mxu0  ;;  %v714_v48 = vpop.f32.mrf.mxu1 }
 0x190   :  { %v840_v51 = vmax.f32 %v518_v43, 0.0  ;;  %v842_v52 = vmax.f32 %v711_v44, 0.0  ;;  %v907_v62 = vpack.c.bf16 %v839_v45, %v835_v53  ;;  %v909_v63 = vpack.c.bf16 %v841_v46, %v837_v54 }
 0x191   :  { %v523_v55 = vpop.f32.mrf.mxu0  ;;  %v716_v56 = vpop.f32.mrf.mxu1  ;;  %v522_v7 = vadd.f32 %v521_v47, %v2581_v61  ;;  %v715_v8 = vadd.f32 %v714_v48, %v2583_v0 }
 0x192   :  { %v908_v57 = vpack.c.bf16 %v840_v51, %v836_v49  ;;  %v910_v58 = vpack.c.bf16 %v842_v52, %v838_v50  ;;  %v524_v1 = vadd.f32 %v523_v55, %v2577_v59  ;;  %v717_v4 = vadd.f32 %v716_v56, %v2579_v60 }
 0x193   :  { %v525_v2 = vpop.f32.mrf.mxu0  ;;  %v718_v3 = vpop.f32.mrf.mxu1  ;;  %v843_v19 = vmax.f32 %v522_v7, 0.0  ;;  %v845_v20 = vmax.f32 %v715_v8, 0.0 }
 0x194   :  { %v526_v5 = vadd.f32 %v525_v2, %v2581_v61  ;;  %v719_v6 = vadd.f32 %v718_v3, %v2583_v0  ;;  %1322 = vmatprep.mubr.bf16.mxu0 %v908_v57  ;;  %1483 = vmatprep.mubr.bf16.mxu1 %v910_v58  ;;  %v844_v15 = vmax.f32 %v524_v1, 0.0  ;;  %v846_v16 = vmax.f32 %v717_v4, 0.0 }
 0x195   :  { %v527_v9 = vpop.f32.mrf.mxu0  ;;  %v720_v10 = vpop.f32.mrf.mxu1  ;;  %1323 = vmatmul.mubr.bf16.gmra.mxu0 %v907_v62  ;;  %1484 = vmatmul.mubr.bf16.gmra.mxu1 %v909_v63 }
 0x196   :  { %v528_v11 = vadd.f32 %v527_v9, %v2577_v59  ;;  %v721_v12 = vadd.f32 %v720_v10, %v2579_v60  ;;  %v847_v13 = vmax.f32 %v526_v5, 0.0  ;;  %v849_v14 = vmax.f32 %v719_v6, 0.0  ;;  %v2716_v60 = vld [vmem:[%s3016_s4] ss:$0 sm:$0xff]  ;;  %s2499_s4 = smov [#allocation10]  }
 0x197   :  { %s1857_s17 = sshll.u32 %s2499_s4, 4  ;;  %s1858_s17 = int_to_ptr.vmem [resolvable:$true] %s1857_s17 }
 0x198   :  { %v848_v17 = vmax.f32 %v528_v11, 0.0  ;;  %v850_v18 = vmax.f32 %v721_v12, 0.0  ;;  %v911_v22 = vpack.c.bf16 %v847_v13, %v843_v19  ;;  %v913_v0 = vpack.c.bf16 %v849_v14, %v845_v20  ;;  %s2460_s18 = scalar_lea.vmem %s1858_s17, 4096  ;;  %p2465_p7 = scmp.lt.s32.totalorder %s1858_s17, %s1858_s17 }
 0x199   :  { %p2461_p6 = scmp.ne.s32.totalorder %s1858_s17, %s2460_s18  ;;  %p2466_p8 = scmp.lt.s32.totalorder %s2460_s18, %s2460_s18 }
 0x19a   :  { %v912_v21 = vpack.c.bf16 %v848_v17, %v844_v15  ;;  %v914_v61 = vpack.c.bf16 %v850_v18, %v846_v16 }
 0x19b   :  { %p2467_p9 = por %p2466_p8, %p2465_p7 }
 0x19c   :  { %1330 = vmatprep.mubr.bf16.mxu0 %v912_v21  ;;  %1491 = vmatprep.mubr.bf16.mxu1 %v914_v61 }
 0x19d   :  { %1331 = vmatmul.mubr.bf16.gmra.mxu0 %v911_v22  ;;  %1492 = vmatmul.mubr.bf16.gmra.mxu1 %v913_v0  ;;  %p2468_p10 = pnand %p2467_p9, %p2461_p6 }
 0x1e5   :  { %v1952_v23 = vpop.f32.mrf.mxu0  ;;  %v2064_v59 = vpop.f32.mrf.mxu1 }
 0x1e7   :  { %v1953_v24 = vpop.f32.mrf.mxu0  ;;  %v2065_v25 = vpop.f32.mrf.mxu1 }
 0x1e8   :  { %v1954_v26 = vadd.f32 %v1953_v24, %v1952_v23  ;;  %v2066_v30 = vadd.f32 %v2065_v25, %v2064_v59 }
 0x1e9   :  { %v1955_v27 = vpop.f32.mrf.mxu0  ;;  %v2067_v28 = vpop.f32.mrf.mxu1 }
 0x1ea   :  { %v1213_v29 = vadd.f32 %v1954_v26, %v2716_v60 }
 0x1eb   :  { %v1956_v31 = vpop.f32.mrf.mxu0  ;;  %v2068_v32 = vpop.f32.mrf.mxu1 }
 0x1ec   :  { %v1957_v33 = vadd.f32 %v1956_v31, %v1955_v27  ;;  %v2719_v34 = vadd.f32 %v2066_v30, %v1213_v29  ;;  %v2069_v38 = vadd.f32 %v2068_v32, %v2067_v28 }
 0x1ed   :  { %v1958_v35 = vpop.f32.mrf.mxu0  ;;  %v2070_v36 = vpop.f32.mrf.mxu1 }
 0x1ee   :  { %v1216_v37 = vadd.f32 %v1957_v33, %v2716_v60  ;;  %1500 = vmax.xlane.f32.xlu0 %v2719_v34 }
 0x1ef   :  { %v1959_v39 = vpop.f32.mrf.mxu0  ;;  %v2071_v40 = vpop.f32.mrf.mxu1 }
 0x1f0   :  { %v1960_v41 = vadd.f32 %v1959_v39, %v1958_v35  ;;  %v2723_v42 = vadd.f32 %v2069_v38, %v1216_v37  ;;  %v2072_v46 = vadd.f32 %v2071_v40, %v2070_v36 }
 0x1f1   :  { %v1961_v43 = vpop.f32.mrf.mxu0  ;;  %v2073_v44 = vpop.f32.mrf.mxu1 }
 0x1f2   :  { %v1221_v45 = vadd.f32 %v1960_v41, %v2716_v60  ;;  %1502 = vmax.xlane.f32.xlu0 %v2723_v42 }
 0x1f3   :  { %v1962_v47 = vpop.f32.mrf.mxu0  ;;  %v2074_v48 = vpop.f32.mrf.mxu1 }
 0x1f4   :  { %v1963_v49 = vadd.f32 %v1962_v47, %v1961_v43  ;;  %v2727_v50 = vadd.f32 %v2072_v46, %v1221_v45  ;;  %v2075_v54 = vadd.f32 %v2074_v48, %v2073_v44 }
 0x1f5   :  { %v1964_v51 = vpop.f32.mrf.mxu0  ;;  %v2076_v52 = vpop.f32.mrf.mxu1 }
 0x1f6   :  { %v1224_v53 = vadd.f32 %v1963_v49, %v2716_v60  ;;  %1504 = vmax.xlane.f32.xlu1 %v2727_v50 }
 0x1f7   :  { %v1965_v55 = vpop.f32.mrf.mxu0  ;;  %v2077_v56 = vpop.f32.mrf.mxu1 }
 0x1f8   :  { %v1966_v57 = vadd.f32 %v1965_v55, %v1964_v51  ;;  %v2731_v58 = vadd.f32 %v2075_v54, %v1224_v53  ;;  %v2078_v2 = vadd.f32 %v2077_v56, %v2076_v52 }
 0x1f9   :  { %v1967_v62 = vpop.f32.mrf.mxu0  ;;  %v2079_v63 = vpop.f32.mrf.mxu1 }
 0x1fa   :  { %v1229_v1 = vadd.f32 %v1966_v57, %v2716_v60  ;;  %1506 = vmax.xlane.f32.xlu1 %v2731_v58 }
 0x1fb   :  { %v1968_v3 = vpop.f32.mrf.mxu0  ;;  %v2080_v4 = vpop.f32.mrf.mxu1 }
 0x1fc   :  { %v1969_v5 = vadd.f32 %v1968_v3, %v1967_v62  ;;  %v2735_v6 = vadd.f32 %v2078_v2, %v1229_v1  ;;  %v2081_v10 = vadd.f32 %v2080_v4, %v2079_v63 }
 0x1fd   :  { %v1970_v7 = vpop.f32.mrf.mxu0  ;;  %v2082_v8 = vpop.f32.mrf.mxu1 }
 0x1fe   :  { %v1232_v9 = vadd.f32 %v1969_v5, %v2716_v60  ;;  %1508 = vmax.xlane.f32.xlu0 %v2735_v6 }
 0x1ff   :  { %v1971_v11 = vpop.f32.mrf.mxu0  ;;  %v2083_v12 = vpop.f32.mrf.mxu1 }
 0x200   :  { %v1972_v13 = vadd.f32 %v1971_v11, %v1970_v7  ;;  %v2739_v14 = vadd.f32 %v2081_v10, %v1232_v9  ;;  %v2084_v18 = vadd.f32 %v2083_v12, %v2082_v8 }
 0x201   :  { %v1973_v15 = vpop.f32.mrf.mxu0  ;;  %v2085_v16 = vpop.f32.mrf.mxu1 }
 0x202   :  { %v1237_v17 = vadd.f32 %v1972_v13, %v2716_v60  ;;  %1510 = vmax.xlane.f32.xlu1 %v2739_v14 }
 0x203   :  { %v1974_v19 = vpop.f32.mrf.mxu0  ;;  %v2086_v20 = vpop.f32.mrf.mxu1 }
 0x204   :  { %v1975_v21 = vadd.f32 %v1974_v19, %v1973_v15  ;;  %v2743_v61 = vadd.f32 %v2084_v18, %v1237_v17  ;;  %v2087_v59 = vadd.f32 %v2086_v20, %v2085_v16 }
 0x205   :  { %v1976_v22 = vpop.f32.mrf.mxu0  ;;  %v2088_v0 = vpop.f32.mrf.mxu1 }
 0x206   :  { %v1240_v23 = vadd.f32 %v1975_v21, %v2716_v60  ;;  %1512 = vmax.xlane.f32.xlu0 %v2743_v61 }
 0x207   :  { %v1977_v24 = vpop.f32.mrf.mxu0  ;;  %v2089_v25 = vpop.f32.mrf.mxu1 }
 0x208   :  { %v1978_v26 = vadd.f32 %v1977_v24, %v1976_v22  ;;  %v2747_v27 = vadd.f32 %v2087_v59, %v1240_v23  ;;  %v2090_v31 = vadd.f32 %v2089_v25, %v2088_v0 }
 0x209   :  { %v1979_v28 = vpop.f32.mrf.mxu0  ;;  %v2091_v29 = vpop.f32.mrf.mxu1 }
 0x20a   :  { %v1245_v30 = vadd.f32 %v1978_v26, %v2716_v60  ;;  %1514 = vmax.xlane.f32.xlu1 %v2747_v27 }
 0x20b   :  { %v1980_v32 = vpop.f32.mrf.mxu0  ;;  %v2092_v33 = vpop.f32.mrf.mxu1 }
 0x20c   :  { %v1981_v35 = vadd.f32 %v1980_v32, %v1979_v28  ;;  %v2751_v36 = vadd.f32 %v2090_v31, %v1245_v30  ;;  %v2093_v40 = vadd.f32 %v2092_v33, %v2091_v29 }
 0x20d   :  { %v1982_v37 = vpop.f32.mrf.mxu0  ;;  %v2094_v38 = vpop.f32.mrf.mxu1 }
 0x20e   :  { %v1248_v39 = vadd.f32 %v1981_v35, %v2716_v60  ;;  %1516 = vmax.xlane.f32.xlu0 %v2751_v36 }
 0x20f   :  { %v1983_v41 = vpop.f32.mrf.mxu0  ;;  %v2095_v43 = vpop.f32.mrf.mxu1 }
 0x210   :  { %v1984_v44 = vadd.f32 %v1983_v41, %v1982_v37  ;;  %v2755_v45 = vadd.f32 %v2093_v40, %v1248_v39  ;;  %v2096_v49 = vadd.f32 %v2095_v43, %v2094_v38 }
 0x211   :  { %v1985_v46 = vpop.f32.mrf.mxu0  ;;  %v2097_v47 = vpop.f32.mrf.mxu1 }
 0x212   :  { %v1253_v48 = vadd.f32 %v1984_v44, %v2716_v60  ;;  %1518 = vmax.xlane.f32.xlu1 %v2755_v45 }
 0x213   :  { %v1986_v51 = vpop.f32.mrf.mxu0  ;;  %v2098_v52 = vpop.f32.mrf.mxu1 }
 0x214   :  { %v1987_v53 = vadd.f32 %v1986_v51, %v1985_v46  ;;  %v2759_v54 = vadd.f32 %v2096_v49, %v1253_v48  ;;  %v2099_v62 = vadd.f32 %v2098_v52, %v2097_v47 }
 0x215   :  { %v1988_v55 = vpop.f32.mrf.mxu0  ;;  %v2100_v56 = vpop.f32.mrf.mxu1 }
 0x216   :  { %v1256_v57 = vadd.f32 %v1987_v53, %v2716_v60  ;;  %1520 = vmax.xlane.f32.xlu0 %v2759_v54 }
 0x217   :  { %v1989_v63 = vpop.f32.mrf.mxu0  ;;  %v2101_v1 = vpop.f32.mrf.mxu1 }
 0x218   :  { %v1990_v2 = vadd.f32 %v1989_v63, %v1988_v55  ;;  %v2763_v3 = vadd.f32 %v2099_v62, %v1256_v57  ;;  %v2102_v8 = vadd.f32 %v2101_v1, %v2100_v56 }
 0x219   :  { %v1991_v4 = vpop.f32.mrf.mxu0  ;;  %v2103_v5 = vpop.f32.mrf.mxu1 }
 0x21a   :  { %v1261_v7 = vadd.f32 %v1990_v2, %v2716_v60  ;;  %1522 = vmax.xlane.f32.xlu1 %v2763_v3 }
 0x21b   :  { %v1992_v9 = vpop.f32.mrf.mxu0  ;;  %v2104_v10 = vpop.f32.mrf.mxu1 }
 0x21c   :  { %v1993_v11 = vadd.f32 %v1992_v9, %v1991_v4  ;;  %v2767_v12 = vadd.f32 %v2102_v8, %v1261_v7  ;;  %v2105_v17 = vadd.f32 %v2104_v10, %v2103_v5 }
 0x21d   :  { %v1994_v13 = vpop.f32.mrf.mxu0  ;;  %v2106_v15 = vpop.f32.mrf.mxu1 }
 0x21e   :  { %v1264_v16 = vadd.f32 %v1993_v11, %v2716_v60  ;;  %1524 = vmax.xlane.f32.xlu0 %v2767_v12 }
 0x21f   :  { %v1995_v18 = vpop.f32.mrf.mxu0  ;;  %v2107_v19 = vpop.f32.mrf.mxu1 }
 0x220   :  { %v1996_v20 = vadd.f32 %v1995_v18, %v1994_v13  ;;  %v2771_v21 = vadd.f32 %v2105_v17, %v1264_v16  ;;  %v2108_v59 = vadd.f32 %v2107_v19, %v2106_v15 }
 0x221   :  { %v1997_v22 = vpop.f32.mrf.mxu0  ;;  %v2109_v0 = vpop.f32.mrf.mxu1 }
 0x222   :  { %v1269_v23 = vadd.f32 %v1996_v20, %v2716_v60  ;;  %1526 = vmax.xlane.f32.xlu1 %v2771_v21 }
 0x223   :  { %v1998_v24 = vpop.f32.mrf.mxu0  ;;  %v2110_v25 = vpop.f32.mrf.mxu1 }
 0x224   :  { %v1999_v26 = vadd.f32 %v1998_v24, %v1997_v22  ;;  %v2775_v28 = vadd.f32 %v2108_v59, %v1269_v23  ;;  %v2111_v32 = vadd.f32 %v2110_v25, %v2109_v0 }
 0x225   :  { %v2000_v29 = vpop.f32.mrf.mxu0  ;;  %v2112_v30 = vpop.f32.mrf.mxu1 }
 0x226   :  { %v1272_v31 = vadd.f32 %v1999_v26, %v2716_v60  ;;  %1528 = vmax.xlane.f32.xlu0 %v2775_v28 }
 0x227   :  { %v2001_v33 = vpop.f32.mrf.mxu0  ;;  %v2113_v35 = vpop.f32.mrf.mxu1 }
 0x228   :  { %v2002_v37 = vadd.f32 %v2001_v33, %v2000_v29  ;;  %v2779_v38 = vadd.f32 %v2111_v32, %v1272_v31  ;;  %v2114_v43 = vadd.f32 %v2113_v35, %v2112_v30 }
 0x229   :  { %v2003_v39 = vpop.f32.mrf.mxu0  ;;  %v2115_v40 = vpop.f32.mrf.mxu1 }
 0x22a   :  { %v1277_v41 = vadd.f32 %v2002_v37, %v2716_v60  ;;  %1530 = vmax.xlane.f32.xlu1 %v2779_v38 }
 0x22b   :  { %v2004_v44 = vpop.f32.mrf.mxu0  ;;  %v2116_v46 = vpop.f32.mrf.mxu1 }
 0x22c   :  { %v2005_v47 = vadd.f32 %v2004_v44, %v2003_v39  ;;  %v2783_v48 = vadd.f32 %v2114_v43, %v1277_v41  ;;  %v2117_v53 = vadd.f32 %v2116_v46, %v2115_v40 }
 0x22d   :  { %v2006_v49 = vpop.f32.mrf.mxu0  ;;  %v2118_v51 = vpop.f32.mrf.mxu1 }
 0x22e   :  { %v1280_v52 = vadd.f32 %v2005_v47, %v2716_v60  ;;  %1532 = vmax.xlane.f32.xlu0 %v2783_v48 }
 0x22f   :  { %v2007_v55 = vpop.f32.mrf.mxu0  ;;  %v2119_v56 = vpop.f32.mrf.mxu1 }
 0x230   :  { %v2008_v57 = vadd.f32 %v2007_v55, %v2006_v49  ;;  %v2787_v62 = vadd.f32 %v2117_v53, %v1280_v52  ;;  %v2120_v4 = vadd.f32 %v2119_v56, %v2118_v51 }
 0x231   :  { %v2009_v63 = vpop.f32.mrf.mxu0  ;;  %v2121_v1 = vpop.f32.mrf.mxu1 }
 0x232   :  { %v1285_v2 = vadd.f32 %v2008_v57, %v2716_v60  ;;  %1534 = vmax.xlane.f32.xlu1 %v2787_v62 }
 0x233   :  { %v2010_v5 = vpop.f32.mrf.mxu0  ;;  %v2122_v7 = vpop.f32.mrf.mxu1 }
 0x234   :  { %v2011_v8 = vadd.f32 %v2010_v5, %v2009_v63  ;;  %v2791_v9 = vadd.f32 %v2120_v4, %v1285_v2  ;;  %v2123_v15 = vadd.f32 %v2122_v7, %v2121_v1 }
 0x235   :  { %v2012_v10 = vpop.f32.mrf.mxu0  ;;  %v2124_v11 = vpop.f32.mrf.mxu1 }
 0x236   :  { %v1288_v13 = vadd.f32 %v2011_v8, %v2716_v60  ;;  %1536 = vmax.xlane.f32.xlu0 %v2791_v9 }
 0x237   :  { %v2013_v16 = vpop.f32.mrf.mxu0  ;;  %v2125_v17 = vpop.f32.mrf.mxu1 }
 0x238   :  { %v2014_v18 = vadd.f32 %v2013_v16, %v2012_v10  ;;  %v2795_v19 = vadd.f32 %v2123_v15, %v1288_v13  ;;  %v2126_v23 = vadd.f32 %v2125_v17, %v2124_v11 }
 0x239   :  { %v2015_v20 = vpop.f32.mrf.mxu0  ;;  %v2127_v22 = vpop.f32.mrf.mxu1 }
 0x23a   :  { %v1293_v0 = vadd.f32 %v2014_v18, %v2716_v60  ;;  %1538 = vmax.xlane.f32.xlu1 %v2795_v19 }
 0x23b   :  { %v2016_v59 = vpop.f32.mrf.mxu0  ;;  %v2128_v24 = vpop.f32.mrf.mxu1 }
 0x23c   :  { %v2017_v25 = vadd.f32 %v2016_v59, %v2015_v20  ;;  %v2799_v26 = vadd.f32 %v2126_v23, %v1293_v0  ;;  %v2129_v32 = vadd.f32 %v2128_v24, %v2127_v22 }
 0x23d   :  { %v2018_v29 = vpop.f32.mrf.mxu0  ;;  %v2130_v30 = vpop.f32.mrf.mxu1 }
 0x23e   :  { %v1296_v31 = vadd.f32 %v2017_v25, %v2716_v60  ;;  %1540 = vmax.xlane.f32.xlu0 %v2799_v26 }
 0x23f   :  { %v2019_v33 = vpop.f32.mrf.mxu0  ;;  %v2131_v35 = vpop.f32.mrf.mxu1 }
 0x240   :  { %v2020_v37 = vadd.f32 %v2019_v33, %v2018_v29  ;;  %v2803_v39 = vadd.f32 %v2129_v32, %v1296_v31  ;;  %v2132_v44 = vadd.f32 %v2131_v35, %v2130_v30 }
 0x241   :  { %v2021_v40 = vpop.f32.mrf.mxu0  ;;  %v2133_v41 = vpop.f32.mrf.mxu1 }
 0x242   :  { %v1301_v43 = vadd.f32 %v2020_v37, %v2716_v60  ;;  %1542 = vmax.xlane.f32.xlu1 %v2803_v39 }
 0x243   :  { %v2022_v46 = vpop.f32.mrf.mxu0  ;;  %v2134_v47 = vpop.f32.mrf.mxu1 }
 0x244   :  { %v2023_v49 = vadd.f32 %v2022_v46, %v2021_v40  ;;  %v2807_v51 = vadd.f32 %v2132_v44, %v1301_v43  ;;  %v2135_v56 = vadd.f32 %v2134_v47, %v2133_v41 }
 0x245   :  { %v2024_v52 = vpop.f32.mrf.mxu0  ;;  %v2136_v53 = vpop.f32.mrf.mxu1 }
 0x246   :  { %v1304_v55 = vadd.f32 %v2023_v49, %v2716_v60  ;;  %1544 = vmax.xlane.f32.xlu0 %v2807_v51 }
 0x247   :  { %v2025_v57 = vpop.f32.mrf.mxu0  ;;  %v2137_v63 = vpop.f32.mrf.mxu1 }
 0x248   :  { %v2026_v1 = vadd.f32 %v2025_v57, %v2024_v52  ;;  %v2811_v2 = vadd.f32 %v2135_v56, %v1304_v55  ;;  %v2138_v8 = vadd.f32 %v2137_v63, %v2136_v53 }
 0x249   :  { %v2027_v4 = vpop.f32.mrf.mxu0  ;;  %v2139_v5 = vpop.f32.mrf.mxu1 }
 0x24a   :  { %v1309_v7 = vadd.f32 %v2026_v1, %v2716_v60  ;;  %1546 = vmax.xlane.f32.xlu1 %v2811_v2 }
 0x24b   :  { %v2028_v10 = vpop.f32.mrf.mxu0  ;;  %v2140_v11 = vpop.f32.mrf.mxu1 }
 0x24c   :  { %v2029_v13 = vadd.f32 %v2028_v10, %v2027_v4  ;;  %v2815_v15 = vadd.f32 %v2138_v8, %v1309_v7  ;;  %v2141_v20 = vadd.f32 %v2140_v11, %v2139_v5 }
 0x24d   :  { %v2030_v16 = vpop.f32.mrf.mxu0  ;;  %v2142_v17 = vpop.f32.mrf.mxu1 }
 0x24e   :  { %v1312_v18 = vadd.f32 %v2029_v13, %v2716_v60  ;;  %1548 = vmax.xlane.f32.xlu0 %v2815_v15 }
 0x24f   :  { %v2031_v22 = vpop.f32.mrf.mxu0  ;;  %v2143_v0 = vpop.f32.mrf.mxu1 }
 0x250   :  { %v2032_v23 = vadd.f32 %v2031_v22, %v2030_v16  ;;  %v2819_v59 = vadd.f32 %v2141_v20, %v1312_v18  ;;  %v2144_v30 = vadd.f32 %v2143_v0, %v2142_v17 }
 0x251   :  { %v2033_v24 = vpop.f32.mrf.mxu0  ;;  %v2145_v25 = vpop.f32.mrf.mxu1 }
 0x252   :  { %v1317_v29 = vadd.f32 %v2032_v23, %v2716_v60  ;;  %1550 = vmax.xlane.f32.xlu1 %v2819_v59 }
 0x253   :  { %v2034_v31 = vpop.f32.mrf.mxu0  ;;  %v2146_v32 = vpop.f32.mrf.mxu1 }
 0x254   :  { %v2035_v33 = vadd.f32 %v2034_v31, %v2033_v24  ;;  %v2823_v35 = vadd.f32 %v2144_v30, %v1317_v29  ;;  %v2147_v43 = vadd.f32 %v2146_v32, %v2145_v25 }
 0x255   :  { %v2036_v37 = vpop.f32.mrf.mxu0  ;;  %v2148_v40 = vpop.f32.mrf.mxu1 }
 0x256   :  { %v1320_v41 = vadd.f32 %v2035_v33, %v2716_v60  ;;  %1552 = vmax.xlane.f32.xlu0 %v2823_v35 }
 0x257   :  { %v2037_v44 = vpop.f32.mrf.mxu0  ;;  %v2149_v46 = vpop.f32.mrf.mxu1 }
 0x258   :  { %v2038_v47 = vadd.f32 %v2037_v44, %v2036_v37  ;;  %v2827_v49 = vadd.f32 %v2147_v43, %v1320_v41  ;;  %v2150_v56 = vadd.f32 %v2149_v46, %v2148_v40 }
 0x259   :  { %v2039_v52 = vpop.f32.mrf.mxu0  ;;  %v2151_v53 = vpop.f32.mrf.mxu1 }
 0x25a   :  { %v1325_v55 = vadd.f32 %v2038_v47, %v2716_v60  ;;  %1554 = vmax.xlane.f32.xlu1 %v2827_v49 }
 0x25b   :  { %v2040_v57 = vpop.f32.mrf.mxu0  ;;  %v2152_v63 = vpop.f32.mrf.mxu1 }
 0x25c   :  { %v2041_v1 = vadd.f32 %v2040_v57, %v2039_v52  ;;  %v2831_v4 = vadd.f32 %v2150_v56, %v1325_v55  ;;  %v2153_v10 = vadd.f32 %v2152_v63, %v2151_v53 }
 0x25d   :  { %v2042_v5 = vpop.f32.mrf.mxu0  ;;  %v2154_v7 = vpop.f32.mrf.mxu1 }
 0x25e   :  { %v1328_v8 = vadd.f32 %v2041_v1, %v2716_v60  ;;  %1556 = vmax.xlane.f32.xlu0 %v2831_v4 }
 0x25f   :  { %v2043_v11 = vpop.f32.mrf.mxu0  ;;  %v2155_v13 = vpop.f32.mrf.mxu1 }
 0x260   :  { %v2044_v16 = vadd.f32 %v2043_v11, %v2042_v5  ;;  %v2835_v17 = vadd.f32 %v2153_v10, %v1328_v8  ;;  %v2156_v0 = vadd.f32 %v2155_v13, %v2154_v7 }
 0x261   :  { %v2045_v18 = vpop.f32.mrf.mxu0  ;;  %v2157_v20 = vpop.f32.mrf.mxu1 }
 0x262   :  { %v1333_v22 = vadd.f32 %v2044_v16, %v2716_v60  ;;  %1558 = vmax.xlane.f32.xlu1 %v2835_v17 }
 0x263   :  { %v2046_v23 = vpop.f32.mrf.mxu0  ;;  %v2158_v24 = vpop.f32.mrf.mxu1 }
 0x264   :  { %v2047_v25 = vadd.f32 %v2046_v23, %v2045_v18  ;;  %v2839_v29 = vadd.f32 %v2156_v0, %v1333_v22  ;;  %v2159_v31 = vadd.f32 %v2158_v24, %v2157_v20 }
 0x266   :  { %v1336_v30 = vadd.f32 %v2047_v25, %v2716_v60  ;;  %1560 = vmax.xlane.f32.xlu0 %v2839_v29 }
 0x268   :  { %v2843_v32 = vadd.f32 %v2159_v31, %v1336_v30 }
 0x26a   :  { %1562 = vmax.xlane.f32.xlu1 %v2843_v32 }
 0x277   :  { %v1501_v33 = vpop.xlane.xlu0 %1500 }
 0x278   :  { %v2847_v37 = vsub.f32 %v2719_v34, %v1501_v33 }
 0x27a   :  { %v1596_v40 = vmul.f32 1.442695, %v2847_v37 }
 0x27b   :  { %v1503_v41 = vpop.xlane.xlu0 %1502 }
 0x27c   :  { %2252 = vpow2.f32 %v1596_v40  ;;  %v2851_v43 = vsub.f32 %v2723_v42, %v1503_v41 }
 0x27e   :  { %v1598_v60 = vmul.f32 1.442695, %v2851_v43 }
 0x27f   :  { %v1505_v44 = vpop.xlane.xlu1 %1504 }
 0x280   :  { %2254 = vpow2.f32 %v1598_v60  ;;  %v2855_v46 = vsub.f32 %v2727_v50, %v1505_v44 }
 0x282   :  { %v1600_v47 = vmul.f32 1.442695, %v2855_v46 }
 0x283   :  { %v1507_v52 = vpop.xlane.xlu1 %1506 }
 0x284   :  { %2256 = vpow2.f32 %v1600_v47  ;;  %v2859_v34 = vsub.f32 %v2731_v58, %v1507_v52 }
 0x286   :  { %v1602_v53 = vmul.f32 1.442695, %v2859_v34 }
 0x287   :  { %v1509_v55 = vpop.xlane.xlu0 %1508 }
 0x288   :  { %2258 = vpow2.f32 %v1602_v53  ;;  %v2863_v42 = vsub.f32 %v2735_v6, %v1509_v55 }
 0x289   :  { %v2253_v56 = vpop.eup %2252 }
 0x28a   :  { %v1604_v57 = vmul.f32 1.442695, %v2863_v42  ;;  %1660 = vadd.xlane.f32.xlu0 %v2253_v56 }
 0x28b   :  { %v1511_v50 = vpop.xlane.xlu1 %1510 }
 0x28c   :  { %2260 = vpow2.f32 %v1604_v57  ;;  %v2867_v63 = vsub.f32 %v2739_v14, %v1511_v50 }
 0x28d   :  { %v2255_v1 = vpop.eup %2254 }
 0x28e   :  { %v1606_v58 = vmul.f32 1.442695, %v2867_v63  ;;  %1662 = vadd.xlane.f32.xlu1 %v2255_v1 }
 0x28f   :  { %v1513_v5 = vpop.xlane.xlu0 %1512 }
 0x290   :  { %2262 = vpow2.f32 %v1606_v58  ;;  %v2871_v7 = vsub.f32 %v2743_v61, %v1513_v5 }
 0x291   :  { %v2257_v6 = vpop.eup %2256 }
 0x292   :  { %v1608_v8 = vmul.f32 1.442695, %v2871_v7  ;;  %1664 = vadd.xlane.f32.xlu0 %v2257_v6 }
 0x293   :  { %v1515_v10 = vpop.xlane.xlu1 %1514 }
 0x294   :  { %2264 = vpow2.f32 %v1608_v8  ;;  %v2875_v11 = vsub.f32 %v2747_v27, %v1515_v10 }
 0x295   :  { %v2259_v14 = vpop.eup %2258 }
 0x296   :  { %v1610_v13 = vmul.f32 1.442695, %v2875_v11  ;;  %1666 = vadd.xlane.f32.xlu1 %v2259_v14 }
 0x297   :  { %v1517_v16 = vpop.xlane.xlu0 %1516 }
 0x298   :  { %2266 = vpow2.f32 %v1610_v13  ;;  %v2879_v18 = vsub.f32 %v2751_v36, %v1517_v16 }
 0x299   :  { %v2261_v61 = vpop.eup %2260 }
 0x29a   :  { %v1612_v20 = vmul.f32 1.442695, %v2879_v18  ;;  %1668 = vadd.xlane.f32.xlu0 %v2261_v61 }
 0x29b   :  { %v1519_v22 = vpop.xlane.xlu1 %1518 }
 0x29c   :  { %2268 = vpow2.f32 %v1612_v20  ;;  %v2883_v0 = vsub.f32 %v2755_v45, %v1519_v22 }
 0x29d   :  { %v2263_v27 = vpop.eup %2262 }
 0x29e   :  { %v1614_v23 = vmul.f32 1.442695, %v2883_v0  ;;  %1670 = vadd.xlane.f32.xlu1 %v2263_v27 }
 0x29f   :  { %v1521_v24 = vpop.xlane.xlu0 %1520 }
 0x2a0   :  { %2270 = vpow2.f32 %v1614_v23  ;;  %v2887_v25 = vsub.f32 %v2759_v54, %v1521_v24 }
 0x2a1   :  { %v2265_v36 = vpop.eup %2264 }
 0x2a2   :  { %v1616_v30 = vmul.f32 1.442695, %v2887_v25  ;;  %1672 = vadd.xlane.f32.xlu0 %v2265_v36 }
 0x2a3   :  { %v1523_v31 = vpop.xlane.xlu1 %1522 }
 0x2a4   :  { %2272 = vpow2.f32 %v1616_v30  ;;  %v2891_v33 = vsub.f32 %v2763_v3, %v1523_v31 }
 0x2a5   :  { %v2267_v45 = vpop.eup %2266 }
 0x2a6   :  { %v1618_v40 = vmul.f32 1.442695, %v2891_v33  ;;  %1674 = vadd.xlane.f32.xlu1 %v2267_v45 }
 0x2a7   :  { %v1525_v41 = vpop.xlane.xlu0 %1524 }
 0x2a8   :  { %2274 = vpow2.f32 %v1618_v40  ;;  %v2895_v60 = vsub.f32 %v2767_v12, %v1525_v41 }
 0x2a9   :  { %v2269_v54 = vpop.eup %2268 }
 0x2aa   :  { %v1620_v44 = vmul.f32 1.442695, %v2895_v60  ;;  %1676 = vadd.xlane.f32.xlu0 %v2269_v54 }
 0x2ab   :  { %v1527_v47 = vpop.xlane.xlu1 %1526 }
 0x2ac   :  { %2276 = vpow2.f32 %v1620_v44  ;;  %v2899_v52 = vsub.f32 %v2771_v21, %v1527_v47 }
 0x2ad   :  { %v2271_v3 = vpop.eup %2270 }
 0x2ae   :  { %v1622_v53 = vmul.f32 1.442695, %v2899_v52  ;;  %1678 = vadd.xlane.f32.xlu1 %v2271_v3 }
 0x2af   :  { %v1529_v55 = vpop.xlane.xlu0 %1528 }
 0x2b0   :  { %2278 = vpow2.f32 %v1622_v53  ;;  %v2903_v56 = vsub.f32 %v2775_v28, %v1529_v55 }
 0x2b1   :  { %v2273_v12 = vpop.eup %2272 }
 0x2b2   :  { %v1624_v57 = vmul.f32 1.442695, %v2903_v56  ;;  %1680 = vadd.xlane.f32.xlu0 %v2273_v12 }
 0x2b3   :  { %v1531_v50 = vpop.xlane.xlu1 %1530 }
 0x2b4   :  { %2280 = vpow2.f32 %v1624_v57  ;;  %v2907_v1 = vsub.f32 %v2779_v38, %v1531_v50 }
 0x2b5   :  { %v2275_v21 = vpop.eup %2274 }
 0x2b6   :  { %v1626_v58 = vmul.f32 1.442695, %v2907_v1  ;;  %1682 = vadd.xlane.f32.xlu1 %v2275_v21 }
 0x2b7   :  { %v1533_v5 = vpop.xlane.xlu0 %1532 }
 0x2b8   :  { %2282 = vpow2.f32 %v1626_v58  ;;  %v2911_v6 = vsub.f32 %v2783_v48, %v1533_v5 }
 0x2b9   :  { %v2277_v28 = vpop.eup %2276 }
 0x2ba   :  { %v1628_v8 = vmul.f32 1.442695, %v2911_v6  ;;  %1684 = vadd.xlane.f32.xlu0 %v2277_v28 }
 0x2bb   :  { %v1535_v10 = vpop.xlane.xlu1 %1534 }
 0x2bc   :  { %2284 = vpow2.f32 %v1628_v8  ;;  %v2915_v14 = vsub.f32 %v2787_v62, %v1535_v10 }
 0x2bd   :  { %v2279_v38 = vpop.eup %2278 }
 0x2be   :  { %v1630_v13 = vmul.f32 1.442695, %v2915_v14  ;;  %1686 = vadd.xlane.f32.xlu1 %v2279_v38 }
 0x2bf   :  { %v1537_v16 = vpop.xlane.xlu0 %1536 }
 0x2c0   :  { %2286 = vpow2.f32 %v1630_v13  ;;  %v2919_v61 = vsub.f32 %v2791_v9, %v1537_v16 }
 0x2c1   :  { %v2281_v48 = vpop.eup %2280 }
 0x2c2   :  { %v1632_v20 = vmul.f32 1.442695, %v2919_v61  ;;  %1688 = vadd.xlane.f32.xlu0 %v2281_v48 }
 0x2c3   :  { %v1539_v22 = vpop.xlane.xlu1 %1538 }
 0x2c4   :  { %2288 = vpow2.f32 %v1632_v20  ;;  %v2923_v27 = vsub.f32 %v2795_v19, %v1539_v22 }
 0x2c5   :  { %v2283_v62 = vpop.eup %2282 }
 0x2c6   :  { %v1634_v23 = vmul.f32 1.442695, %v2923_v27  ;;  %1690 = vadd.xlane.f32.xlu1 %v2283_v62 }
 0x2c7   :  { %v1541_v24 = vpop.xlane.xlu0 %1540 }
 0x2c8   :  { %2290 = vpow2.f32 %v1634_v23  ;;  %v2927_v36 = vsub.f32 %v2799_v26, %v1541_v24 }
 0x2c9   :  { %v2285_v9 = vpop.eup %2284 }
 0x2ca   :  { %v1636_v30 = vmul.f32 1.442695, %v2927_v36  ;;  %1692 = vadd.xlane.f32.xlu0 %v2285_v9 }
 0x2cb   :  { %v1543_v31 = vpop.xlane.xlu1 %1542 }
 0x2cc   :  { %2292 = vpow2.f32 %v1636_v30  ;;  %v2931_v45 = vsub.f32 %v2803_v39, %v1543_v31 }
 0x2cd   :  { %v2287_v19 = vpop.eup %2286 }
 0x2ce   :  { %v1638_v40 = vmul.f32 1.442695, %v2931_v45  ;;  %1694 = vadd.xlane.f32.xlu1 %v2287_v19 }
 0x2cf   :  { %v1545_v41 = vpop.xlane.xlu0 %1544 }
 0x2d0   :  { %2294 = vpow2.f32 %v1638_v40  ;;  %v2935_v54 = vsub.f32 %v2807_v51, %v1545_v41 }
 0x2d1   :  { %v2289_v26 = vpop.eup %2288 }
 0x2d2   :  { %v1640_v44 = vmul.f32 1.442695, %v2935_v54  ;;  %1696 = vadd.xlane.f32.xlu0 %v2289_v26 }
 0x2d3   :  { %v1547_v47 = vpop.xlane.xlu1 %1546 }
 0x2d4   :  { %2296 = vpow2.f32 %v1640_v44  ;;  %v2939_v3 = vsub.f32 %v2811_v2, %v1547_v47 }
 0x2d5   :  { %v2291_v39 = vpop.eup %2290 }
 0x2d6   :  { %v1642_v53 = vmul.f32 1.442695, %v2939_v3  ;;  %1698 = vadd.xlane.f32.xlu1 %v2291_v39 }
 0x2d7   :  { %v1549_v55 = vpop.xlane.xlu0 %1548 }
 0x2d8   :  { %2298 = vpow2.f32 %v1642_v53  ;;  %v2943_v12 = vsub.f32 %v2815_v15, %v1549_v55 }
 0x2d9   :  { %v2293_v51 = vpop.eup %2292 }
 0x2da   :  { %v1644_v57 = vmul.f32 1.442695, %v2943_v12  ;;  %1700 = vadd.xlane.f32.xlu0 %v2293_v51 }
 0x2db   :  { %v1551_v50 = vpop.xlane.xlu1 %1550 }
 0x2dc   :  { %2300 = vpow2.f32 %v1644_v57  ;;  %v2947_v21 = vsub.f32 %v2819_v59, %v1551_v50 }
 0x2dd   :  { %v2295_v2 = vpop.eup %2294 }
 0x2de   :  { %v1646_v58 = vmul.f32 1.442695, %v2947_v21  ;;  %1702 = vadd.xlane.f32.xlu1 %v2295_v2 }
 0x2df   :  { %v1553_v5 = vpop.xlane.xlu0 %1552 }
 0x2e0   :  { %2302 = vpow2.f32 %v1646_v58  ;;  %v2951_v28 = vsub.f32 %v2823_v35, %v1553_v5 }
 0x2e1   :  { %v2297_v15 = vpop.eup %2296 }
 0x2e2   :  { %v1648_v8 = vmul.f32 1.442695, %v2951_v28  ;;  %1704 = vadd.xlane.f32.xlu0 %v2297_v15 }
 0x2e3   :  { %v1555_v10 = vpop.xlane.xlu1 %1554 }
 0x2e4   :  { %2304 = vpow2.f32 %v1648_v8  ;;  %v2955_v38 = vsub.f32 %v2827_v49, %v1555_v10 }
 0x2e5   :  { %v2299_v59 = vpop.eup %2298 }
 0x2e6   :  { %v1650_v13 = vmul.f32 1.442695, %v2955_v38  ;;  %1706 = vadd.xlane.f32.xlu1 %v2299_v59 }
 0x2e7   :  { %v1557_v16 = vpop.xlane.xlu0 %1556 }
 0x2e8   :  { %2306 = vpow2.f32 %v1650_v13  ;;  %v2959_v48 = vsub.f32 %v2831_v4, %v1557_v16 }
 0x2e9   :  { %v2301_v35 = vpop.eup %2300 }
 0x2ea   :  { %v1652_v20 = vmul.f32 1.442695, %v2959_v48  ;;  %1708 = vadd.xlane.f32.xlu0 %v2301_v35 }
 0x2eb   :  { %v1559_v22 = vpop.xlane.xlu1 %1558 }
 0x2ec   :  { %2308 = vpow2.f32 %v1652_v20  ;;  %v2963_v62 = vsub.f32 %v2835_v17, %v1559_v22 }
 0x2ed   :  { %v2303_v49 = vpop.eup %2302 }
 0x2ee   :  { %v1654_v23 = vmul.f32 1.442695, %v2963_v62  ;;  %1710 = vadd.xlane.f32.xlu1 %v2303_v49 }
 0x2ef   :  { %v1561_v24 = vpop.xlane.xlu0 %1560 }
 0x2f0   :  { %2310 = vpow2.f32 %v1654_v23  ;;  %v2967_v9 = vsub.f32 %v2839_v29, %v1561_v24 }
 0x2f1   :  { %v2305_v4 = vpop.eup %2304 }
 0x2f2   :  { %v1656_v30 = vmul.f32 1.442695, %v2967_v9  ;;  %1712 = vadd.xlane.f32.xlu0 %v2305_v4 }
 0x2f3   :  { %v1563_v31 = vpop.xlane.xlu1 %1562 }
 0x2f4   :  { %2312 = vpow2.f32 %v1656_v30  ;;  %v2971_v19 = vsub.f32 %v2843_v32, %v1563_v31 }
 0x2f5   :  { %v2307_v17 = vpop.eup %2306 }
 0x2f6   :  { %v1658_v40 = vmul.f32 1.442695, %v2971_v19  ;;  %1714 = vadd.xlane.f32.xlu1 %v2307_v17 }
 0x2f8   :  { %2314 = vpow2.f32 %v1658_v40 }
 0x2f9   :  { %v2309_v41 = vpop.eup %2308 }
 0x2fa   :  { %1716 = vadd.xlane.f32.xlu0 %v2309_v41 }
 0x2fd   :  { %v2311_v26 = vpop.eup %2310 }
 0x2fe   :  { %1718 = vadd.xlane.f32.xlu1 %v2311_v26 }
 0x301   :  { %v2313_v29 = vpop.eup %2312 }
 0x302   :  { %1720 = vadd.xlane.f32.xlu0 %v2313_v29 }
 0x305   :  { %v2315_v44 = vpop.eup %2314 }
 0x306   :  { %1722 = vadd.xlane.f32.xlu1 %v2315_v44 }
 0x313   :  { %v1661_v47 = vpop.xlane.xlu0 %1660 }
 0x314   :  { %2316 = vlog2.f32 %v1661_v47 }
 0x317   :  { %v1663_v39 = vpop.xlane.xlu1 %1662 }
 0x318   :  { %2318 = vlog2.f32 %v1663_v39 }
 0x31b   :  { %v1665_v53 = vpop.xlane.xlu0 %1664 }
 0x31c   :  { %2320 = vlog2.f32 %v1665_v53 }
 0x31f   :  { %v1667_v32 = vpop.xlane.xlu1 %1666 }
 0x320   :  { %2322 = vlog2.f32 %v1667_v32 }
 0x321   :  { %v2317_v55 = vpop.eup %2316 }
 0x322   :  { %v1725_v51 = vmul.f32 0.6931472, %v2317_v55 }
 0x323   :  { %v1669_v57 = vpop.xlane.xlu0 %1668 }
 0x324   :  { %v1788_v50 = vsub.f32 %v2847_v37, %v1725_v51  ;;  %2324 = vlog2.f32 %v1669_v57 }
 0x325   :  { %v2319_v2 = vpop.eup %2318 }
 0x326   :  { %1820 = vst [vmem:[#allocation10] sm:$0xff] %v1788_v50  ;;  %v1727_v58 = vmul.f32 0.6931472, %v2319_v2 }
 0x327   :  { %v1671_v5 = vpop.xlane.xlu1 %1670 }
 0x328   :  { %v1789_v15 = vsub.f32 %v2851_v43, %v1727_v58  ;;  %2326 = vlog2.f32 %v1671_v5 }
 0x329   :  { %v2321_v8 = vpop.eup %2320 }
 0x32a   :  { %1821 = vst [vmem:[#allocation10 + $0x8] sm:$0xff] %v1789_v15  ;;  %v1729_v10 = vmul.f32 0.6931472, %v2321_v8 }
 0x32b   :  { %v1673_v59 = vpop.xlane.xlu0 %1672 }
 0x32c   :  { %v1790_v13 = vsub.f32 %v2855_v46, %v1729_v10  ;;  %2328 = vlog2.f32 %v1673_v59 }
 0x32d   :  { %v2323_v16 = vpop.eup %2322 }
 0x32e   :  { %1822 = vst [vmem:[#allocation10 + $0x10] sm:$0xff] %v1790_v13  ;;  %v1731_v35 = vmul.f32 0.6931472, %v2323_v16 }
 0x32f   :  { %v1675_v20 = vpop.xlane.xlu1 %1674 }
 0x330   :  { %v1791_v37 = vsub.f32 %v2859_v34, %v1731_v35  ;;  %2330 = vlog2.f32 %v1675_v20 }
 0x331   :  { %v2325_v22 = vpop.eup %2324 }
 0x332   :  { %1823 = vst [vmem:[#allocation10 + $0x18] sm:$0xff] %v1791_v37  ;;  %v1733_v49 = vmul.f32 0.6931472, %v2325_v22 }
 0x333   :  { %v1677_v23 = vpop.xlane.xlu0 %1676 }
 0x334   :  { %v1792_v43 = vsub.f32 %v2863_v42, %v1733_v49  ;;  %2332 = vlog2.f32 %v1677_v23 }
 0x335   :  { %v2327_v24 = vpop.eup %2326 }
 0x336   :  { %1824 = vst [vmem:[#allocation10 + $0x20] sm:$0xff] %v1792_v43  ;;  %v1735_v4 = vmul.f32 0.6931472, %v2327_v24 }
 0x337   :  { %v1679_v30 = vpop.xlane.xlu1 %1678 }
 0x338   :  { %v1793_v46 = vsub.f32 %v2867_v63, %v1735_v4  ;;  %2334 = vlog2.f32 %v1679_v30 }
 0x339   :  { %v2329_v31 = vpop.eup %2328 }
 0x33a   :  { %1825 = vst [vmem:[#allocation10 + $0x28] sm:$0xff] %v1793_v46  ;;  %v1737_v17 = vmul.f32 0.6931472, %v2329_v31 }
 0x33b   :  { %v1681_v40 = vpop.xlane.xlu0 %1680 }
 0x33c   :  { %v1794_v34 = vsub.f32 %v2871_v7, %v1737_v17  ;;  %2336 = vlog2.f32 %v1681_v40 }
 0x33d   :  { %v2331_v41 = vpop.eup %2330 }
 0x33e   :  { %1826 = vst [vmem:[#allocation10 + $0x30] sm:$0xff] %v1794_v34  ;;  %v1739_v26 = vmul.f32 0.6931472, %v2331_v41 }
 0x33f   :  { %v1683_v29 = vpop.xlane.xlu1 %1682 }
 0x340   :  { %v1795_v42 = vsub.f32 %v2875_v11, %v1739_v26  ;;  %2338 = vlog2.f32 %v1683_v29 }
 0x341   :  { %v2333_v44 = vpop.eup %2332 }
 0x342   :  { %1827 = vst [vmem:[#allocation10 + $0x38] sm:$0xff] %v1795_v42  ;;  %v1741_v47 = vmul.f32 0.6931472, %v2333_v44 }
 0x343   :  { %v1685_v39 = vpop.xlane.xlu0 %1684 }
 0x344   :  { %v1796_v63 = vsub.f32 %v2879_v18, %v1741_v47  ;;  %2340 = vlog2.f32 %v1685_v39 }
 0x345   :  { %v2335_v53 = vpop.eup %2334 }
 0x346   :  { %1828 = vst [vmem:[#allocation10 + $0x40] sm:$0xff] %v1796_v63  ;;  %v1743_v32 = vmul.f32 0.6931472, %v2335_v53 }
 0x347   :  { %v1687_v55 = vpop.xlane.xlu1 %1686 }
 0x348   :  { %v1797_v7 = vsub.f32 %v2883_v0, %v1743_v32  ;;  %2342 = vlog2.f32 %v1687_v55 }
 0x349   :  { %v2337_v51 = vpop.eup %2336 }
 0x34a   :  { %1829 = vst [vmem:[#allocation10 + $0x48] sm:$0xff] %v1797_v7  ;;  %v1745_v57 = vmul.f32 0.6931472, %v2337_v51 }
 0x34b   :  { %v1689_v50 = vpop.xlane.xlu0 %1688 }
 0x34c   :  { %v1798_v11 = vsub.f32 %v2887_v25, %v1745_v57  ;;  %2344 = vlog2.f32 %v1689_v50 }
 0x34d   :  { %v2339_v2 = vpop.eup %2338 }
 0x34e   :  { %1830 = vst [vmem:[#allocation10 + $0x50] sm:$0xff] %v1798_v11  ;;  %v1747_v58 = vmul.f32 0.6931472, %v2339_v2 }
 0x34f   :  { %v1691_v5 = vpop.xlane.xlu1 %1690 }
 0x350   :  { %v1799_v18 = vsub.f32 %v2891_v33, %v1747_v58  ;;  %2346 = vlog2.f32 %v1691_v5 }
 0x351   :  { %v2341_v15 = vpop.eup %2340 }
 0x352   :  { %1831 = vst [vmem:[#allocation10 + $0x58] sm:$0xff] %v1799_v18  ;;  %v1749_v8 = vmul.f32 0.6931472, %v2341_v15 }
 0x353   :  { %v1693_v10 = vpop.xlane.xlu0 %1692 }
 0x354   :  { %v1800_v0 = vsub.f32 %v2895_v60, %v1749_v8  ;;  %2348 = vlog2.f32 %v1693_v10 }
 0x355   :  { %v2343_v59 = vpop.eup %2342 }
 0x356   :  { %1832 = vst [vmem:[#allocation10 + $0x60] sm:$0xff] %v1800_v0  ;;  %v1751_v13 = vmul.f32 0.6931472, %v2343_v59 }
 0x357   :  { %v1695_v16 = vpop.xlane.xlu1 %1694 }
 0x358   :  { %v1801_v25 = vsub.f32 %v2899_v52, %v1751_v13  ;;  %2350 = vlog2.f32 %v1695_v16 }
 0x359   :  { %v2345_v35 = vpop.eup %2344 }
 0x35a   :  { %1833 = vst [vmem:[#allocation10 + $0x68] sm:$0xff] %v1801_v25  ;;  %v1753_v20 = vmul.f32 0.6931472, %v2345_v35 }
 0x35b   :  { %v1697_v37 = vpop.xlane.xlu0 %1696 }
 0x35c   :  { %v1802_v33 = vsub.f32 %v2903_v56, %v1753_v20  ;;  %2352 = vlog2.f32 %v1697_v37 }
 0x35d   :  { %v2347_v22 = vpop.eup %2346 }
 0x35e   :  { %1834 = vst [vmem:[#allocation10 + $0x70] sm:$0xff] %v1802_v33  ;;  %v1755_v49 = vmul.f32 0.6931472, %v2347_v22 }
 0x35f   :  { %v1699_v23 = vpop.xlane.xlu1 %1698 }
 0x360   :  { %v1803_v60 = vsub.f32 %v2907_v1, %v1755_v49  ;;  %2354 = vlog2.f32 %v1699_v23 }
 0x361   :  { %v2349_v43 = vpop.eup %2348 }
 0x362   :  { %1835 = vst [vmem:[#allocation10 + $0x78] sm:$0xff] %v1803_v60  ;;  %v1757_v24 = vmul.f32 0.6931472, %v2349_v43 }
 0x363   :  { %v1701_v4 = vpop.xlane.xlu0 %1700 }
 0x364   :  { %v1804_v52 = vsub.f32 %v2911_v6, %v1757_v24  ;;  %2356 = vlog2.f32 %v1701_v4 }
 0x365   :  { %v2351_v30 = vpop.eup %2350 }
 0x366   :  { %1836 = vst [vmem:[#allocation10 + $0x80] sm:$0xff] %v1804_v52  ;;  %v1759_v46 = vmul.f32 0.6931472, %v2351_v30 }
 0x367   :  { %v1703_v31 = vpop.xlane.xlu1 %1702 }
 0x368   :  { %v1805_v56 = vsub.f32 %v2915_v14, %v1759_v46  ;;  %2358 = vlog2.f32 %v1703_v31 }
 0x369   :  { %v2353_v17 = vpop.eup %2352 }
 0x36a   :  { %1837 = vst [vmem:[#allocation10 + $0x88] sm:$0xff] %v1805_v56  ;;  %v1761_v40 = vmul.f32 0.6931472, %v2353_v17 }
 0x36b   :  { %v1705_v34 = vpop.xlane.xlu0 %1704 }
 0x36c   :  { %v1806_v1 = vsub.f32 %v2919_v61, %v1761_v40  ;;  %2360 = vlog2.f32 %v1705_v34 }
 0x36d   :  { %v2355_v41 = vpop.eup %2354 }
 0x36e   :  { %1838 = vst [vmem:[#allocation10 + $0x90] sm:$0xff] %v1806_v1  ;;  %v1763_v26 = vmul.f32 0.6931472, %v2355_v41 }
 0x36f   :  { %v1707_v29 = vpop.xlane.xlu1 %1706 }
 0x370   :  { %v1807_v6 = vsub.f32 %v2923_v27, %v1763_v26  ;;  %2362 = vlog2.f32 %v1707_v29 }
 0x371   :  { %v2357_v42 = vpop.eup %2356 }
 0x372   :  { %1839 = vst [vmem:[#allocation10 + $0x98] sm:$0xff] %v1807_v6  ;;  %v1765_v44 = vmul.f32 0.6931472, %v2357_v42 }
 0x373   :  { %v1709_v47 = vpop.xlane.xlu0 %1708 }
 0x374   :  { %v1808_v14 = vsub.f32 %v2927_v36, %v1765_v44  ;;  %2364 = vlog2.f32 %v1709_v47 }
 0x375   :  { %v2359_v39 = vpop.eup %2358 }
 0x376   :  { %1840 = vst [vmem:[#allocation10 + $0xa0] sm:$0xff] %v1808_v14  ;;  %v1767_v63 = vmul.f32 0.6931472, %v2359_v39 }
 0x377   :  { %v1711_v53 = vpop.xlane.xlu1 %1710 }
 0x378   :  { %v1809_v61 = vsub.f32 %v2931_v45, %v1767_v63  ;;  %2366 = vlog2.f32 %v1711_v53 }
 0x379   :  { %v2361_v32 = vpop.eup %2360 }
 0x37a   :  { %1841 = vst [vmem:[#allocation10 + $0xa8] sm:$0xff] %v1809_v61  ;;  %v1769_v55 = vmul.f32 0.6931472, %v2361_v32 }
 0x37b   :  { %v1713_v7 = vpop.xlane.xlu0 %1712 }
 0x37c   :  { %v1810_v27 = vsub.f32 %v2935_v54, %v1769_v55  ;;  %2368 = vlog2.f32 %v1713_v7 }
 0x37d   :  { %v2363_v51 = vpop.eup %2362 }
 0x37e   :  { %1842 = vst [vmem:[#allocation10 + $0xb0] sm:$0xff] %v1810_v27  ;;  %v1771_v57 = vmul.f32 0.6931472, %v2363_v51 }
 0x37f   :  { %v1715_v50 = vpop.xlane.xlu1 %1714 }
 0x380   :  { %v1811_v36 = vsub.f32 %v2939_v3, %v1771_v57  ;;  %2370 = vlog2.f32 %v1715_v50 }
 0x381   :  { %v2365_v11 = vpop.eup %2364 }
 0x382   :  { %1843 = vst [vmem:[#allocation10 + $0xb8] sm:$0xff] %v1811_v36  ;;  %v1773_v2 = vmul.f32 0.6931472, %v2365_v11 }
 0x383   :  { %v1717_v58 = vpop.xlane.xlu0 %1716 }
 0x384   :  { %v1812_v45 = vsub.f32 %v2943_v12, %v1773_v2  ;;  %2372 = vlog2.f32 %v1717_v58 }
 0x385   :  { %v2367_v5 = vpop.eup %2366 }
 0x386   :  { %1844 = vst [vmem:[#allocation10 + $0xc0] sm:$0xff] %v1812_v45  ;;  %v1775_v18 = vmul.f32 0.6931472, %v2367_v5 }
 0x387   :  { %v1719_v15 = vpop.xlane.xlu1 %1718 }
 0x388   :  { %v1813_v54 = vsub.f32 %v2947_v21, %v1775_v18  ;;  %2374 = vlog2.f32 %v1719_v15 }
 0x389   :  { %v2369_v8 = vpop.eup %2368 }
 0x38a   :  { %1845 = vst [vmem:[#allocation10 + $0xc8] sm:$0xff] %v1813_v54  ;;  %v1777_v10 = vmul.f32 0.6931472, %v2369_v8 }
 0x38b   :  { %v1721_v0 = vpop.xlane.xlu0 %1720 }
 0x38c   :  { %v1814_v3 = vsub.f32 %v2951_v28, %v1777_v10  ;;  %2376 = vlog2.f32 %v1721_v0 }
 0x38d   :  { %v2371_v59 = vpop.eup %2370 }
 0x38e   :  { %1846 = vst [vmem:[#allocation10 + $0xd0] sm:$0xff] %v1814_v3  ;;  %v1779_v13 = vmul.f32 0.6931472, %v2371_v59 }
 0x38f   :  { %v1723_v16 = vpop.xlane.xlu1 %1722 }
 0x390   :  { %v1815_v12 = vsub.f32 %v2955_v38, %v1779_v13  ;;  %2378 = vlog2.f32 %v1723_v16 }
 0x391   :  { %v2373_v25 = vpop.eup %2372 }
 0x392   :  { %1847 = vst [vmem:[#allocation10 + $0xd8] sm:$0xff] %v1815_v12  ;;  %v1781_v35 = vmul.f32 0.6931472, %v2373_v25 }
 0x394   :  { %v1816_v21 = vsub.f32 %v2959_v48, %v1781_v35 }
 0x395   :  { %v2375_v20 = vpop.eup %2374 }
 0x396   :  { %1848 = vst [vmem:[#allocation10 + $0xe0] sm:$0xff] %v1816_v21  ;;  %v1783_v37 = vmul.f32 0.6931472, %v2375_v20 }
 0x398   :  { %v1817_v33 = vsub.f32 %v2963_v62, %v1783_v37 }
 0x399   :  { %v2377_v22 = vpop.eup %2376 }
 0x39a   :  { %1849 = vst [vmem:[#allocation10 + $0xe8] sm:$0xff] %v1817_v33  ;;  %v1785_v28 = vmul.f32 0.6931472, %v2377_v22 }
 0x39c   :  { %v1818_v49 = vsub.f32 %v2967_v9, %v1785_v28 }
 0x39d   :  { %v2379_v23 = vpop.eup %2378 }
 0x39e   :  { %1850 = vst [vmem:[#allocation10 + $0xf0] sm:$0xff] %v1818_v49  ;;  %v1787_v38 = vmul.f32 0.6931472, %v2379_v23 }
 0x3a0   :  { %v1819_v60 = vsub.f32 %v2971_v19, %v1787_v38 }
 0x3a2   :  { %1851 = vst [vmem:[#allocation10 + $0xf8] sm:$0xff] %v1819_v60 }
 0x3a3   :  { %2471 = shalt.err (!%p2468_p10)
}
 0x3a4   :  { %1863 = dma.vmem_to_hbm [thread:$0]  %s1858_s17, 4096, %s3017_s5, [#allocation4], %s2492_s28, %s2492_s28, %s2493_s29  }
 0x3a5   :  { %2486 = dma.done.wait [#allocation4], 4096  }
 0x3a6   :  { %2487 = vsyncadd [#allocation4], 4294963200 }
 0x3a7   :  { %1867 = vsyncpa [#allocation3], 1 }
 0x3a8   :  { %1868 = vsyncpa [#allocation6], 1 }
 0x3a9   :  { %1869 = vsyncpa [#allocation9], 1 }
 0x3aa   :  { %1870 = vsyncpa [#allocation4], 1 }

</bundles_post_ra>
